<compile_context>
chip_gen: v5e
topology: v5e:2x2
jax: 0.10.0
libtpu: 0.0.40
codegen_flags: <defaults>
</compile_context>

<pallas_src>
import functools
import math

import jax
import jax.numpy as jnp
from jax.experimental import pallas as pl
from jax.experimental.pallas import tpu as pltpu


_NEG_INF = -1e30                           # finite "minus infinity" for masking
_VMEM_LIMIT_BYTES = 32 * 1024 * 1024       # safe on v5e/v6e/v7x, > v5e default
_LINEAR_BLOCK_BUDGET = 10 * 1024 * 1024    # target bytes for one copy of blocks


# ----------------------------------------------------------------------------
# Tile-size helpers
# ----------------------------------------------------------------------------
def _pick_tile(dim, cap):
    """Largest divisor of `dim` that is a multiple of 8 and <= cap, else dim."""
    if dim <= cap:
        return dim
    for t in range(cap - cap % 8, 7, -8):
        if dim % t == 0:
            return t
    # TODO(synk): pad non-tile-multiple dims instead of a full-dim fallback tile.
    return dim


def _pick_lane_tile(dim, cap):
    """Largest divisor of `dim` that is a multiple of 128 and <= cap, else dim."""
    if dim <= cap:
        return dim
    for t in range(cap - cap % 128, 127, -128):
        if dim % t == 0:
            return t
    return dim


def _pick_head_block(n_head, head_dim, max_lanes=256):
    """Largest divisor of n_head with hb * head_dim <= max_lanes (MXU/lane width)."""
    hb = 1
    for d in range(1, n_head + 1):
        if n_head % d == 0 and d * head_dim <= max_lanes:
            hb = d
    return hb


def _rows_for_budget(budget_bytes, fixed_bytes, per_row_bytes):
    return max(8, (budget_bytes - fixed_bytes) // max(per_row_bytes, 1))


# ----------------------------------------------------------------------------
# Kernel 1: fused QKV projection, written head-major.
#   x (B, T, C) @ w_qkv (3H, C, hd) + b_qkv (3H, 1, hd) -> qkv (B, 3H, T, hd)
# The per-head output block has lane width hd (may be < 128 -> masked stores),
# accepted in exchange for removing all JAX-level split/reshape/transpose
# HBM passes downstream.
# ----------------------------------------------------------------------------
def _qkv_proj_kernel(x_ref, w_ref, b_ref, o_ref):
    y = jnp.dot(x_ref[...], w_ref[...], preferred_element_type=jnp.float32)
    o_ref[...] = (y + b_ref[...].astype(jnp.float32)).astype(o_ref.dtype)


def pallas_qkv_projection(x, w_qkv, b_qkv):
    B, T, C = x.shape
    H3, _, hd = w_qkv.shape
    itemsize = jnp.dtype(x.dtype).itemsize
    max_rows = _rows_for_budget(
        _LINEAR_BLOCK_BUDGET,
        fixed_bytes=(C * hd + hd) * itemsize,
        per_row_bytes=(C + hd) * itemsize)
    tm = _pick_tile(T, min(512, max_rows))

    # Grid order (B, rows, head-cols): x block resident across the head-column
    # axis (one pass over activations); W blocks are small (C x hd) per step.
    return pl.pallas_call(
        _qkv_proj_kernel,
        out_shape=jax.ShapeDtypeStruct((B, H3, T, hd), x.dtype),
        grid=(B, T // tm, H3),
        in_specs=[
            pl.BlockSpec((None, tm, C), lambda b, i, j: (b, i, 0)),
            pl.BlockSpec((None, C, hd), lambda b, i, j: (j, 0, 0)),
            pl.BlockSpec((None, 1, hd), lambda b, i, j: (j, 0, 0)),
        ],
        out_specs=pl.BlockSpec((None, None, tm, hd), lambda b, i, j: (b, j, i, 0)),
        compiler_params=pltpu.CompilerParams(
            dimension_semantics=("parallel", "parallel", "parallel"),
            vmem_limit_bytes=_VMEM_LIMIT_BYTES),
    )(x, w_qkv, b_qkv)


# ----------------------------------------------------------------------------
# Kernel 2: flash-style causal attention with online softmax.
#   grid = (B, H // hb, n_sched) where n_sched enumerates only the
#   lower-triangular (q_tile, kv_tile) pairs (scalar-prefetched schedule).
# ----------------------------------------------------------------------------
def _flash_causal_kernel(qi_ref, ki_ref, q_ref, k_ref, v_ref, o_ref,
                         m_scr, l_scr, acc_scr, *, tq, tk, scale):
    t = pl.program_id(2)
    qi = qi_ref[t]
    ki = ki_ref[t]
    q_start = qi * tq
    kv_start = ki * tk

    @pl.when(ki == 0)
    def _init():
        m_scr[...] = jnp.full(m_scr.shape, _NEG_INF, jnp.float32)
        l_scr[...] = jnp.zeros(l_scr.shape, jnp.float32)
        acc_scr[...] = jnp.zeros(acc_scr.shape, jnp.float32)

    # Scale Q (hb*tq*hd mults) instead of the (hb*tq*tk) score matrix.
    q = q_ref[...] * scale                   # (hb, tq, hd), input dtype
    k = k_ref[...]                           # (hb, tk, hd)
    v = v_ref[...]                           # (hb, tk, hd)

    def _scores():
        return jnp.einsum("hqd,hkd->hqk", q, k,
                          preferred_element_type=jnp.float32)   # fp32 (hb,tq,tk)

    def _update(s):
        m_prev = m_scr[...]
        m_new = jnp.maximum(m_prev, jnp.max(s, axis=-1, keepdims=True))
        alpha = jnp.exp(m_prev - m_new)
        p = jnp.exp(s - m_new)
        l_scr[...] = alpha * l_scr[...] + jnp.sum(p, axis=-1, keepdims=True)
        acc_scr[...] = alpha * acc_scr[...] + jnp.einsum(
            "hqk,hkd->hqd", p.astype(v.dtype), v,
            preferred_element_type=jnp.float32)
        m_scr[...] = m_new

    # Only tiles straddling the diagonal pay the iota/compare/select mask cost.
    needs_mask = kv_start + tk > q_start + 1

    @pl.when(needs_mask)
    def _diag_tile():
        s = _scores()
        row = q_start + jax.lax.broadcasted_iota(jnp.int32, s.shape, 1)
        col = kv_start + jax.lax.broadcasted_iota(jnp.int32, s.shape, 2)
        _update(jnp.where(col <= row, s, _NEG_INF))

    @pl.when(jnp.logical_not(needs_mask))
    def _full_tile():
        _update(_scores())

    # Last scheduled kv tile for this q row -> normalize and store.
    is_last = kv_start + tk >= q_start + tq

    @pl.when(is_last)
    def _finalize():
        l = l_scr[...]
        inv = pl.reciprocal(l, approx=True)      # EUP slot (otherwise idle)
        inv = inv * (2.0 - l * inv)              # one Newton step -> ~fp32 exact
        o_ref[...] = (acc_scr[...] * inv).astype(o_ref.dtype)


def pallas_causal_attention(qkv, n_head, head_block, *, block_q=None, block_k=None):
    """qkv: (B, 3H, T, hd) head-major packed Q|K|V -> (B, H, T, hd)."""
    B, H3, T, hd = qkv.shape
    H = H3 // 3
    hb = head_block
    G = H // hb
    tq = block_q or _pick_tile(T, 512)
    tk = block_k or _pick_tile(T, 512)
    scale = 1.0 / math.sqrt(hd)
    nq, nkv = T // tq, T // tk

    # Lower-triangular tile schedule (row-major): only tiles intersecting the
    # causal region are ever visited -> no wasted grid steps.
    sched = [(qi, ki) for qi in range(nq) for ki in range(nkv)
             if ki * tk < (qi + 1) * tq]
    qi_sched = jnp.asarray([s[0] for s in sched], dtype=jnp.int32)
    ki_sched = jnp.asarray([s[1] for s in sched], dtype=jnp.int32)
    n_sched = len(sched)

    # Head-group g reads q heads [g*hb, (g+1)*hb), k at offset H, v at offset 2H.
    def q_map(b, g, t, qi_s, ki_s):
        return (b, g, qi_s[t], 0)

    def k_map(b, g, t, qi_s, ki_s):
        return (b, G + g, ki_s[t], 0)

    def v_map(b, g, t, qi_s, ki_s):
        return (b, 2 * G + g, ki_s[t], 0)

    kernel = functools.partial(_flash_causal_kernel, tq=tq, tk=tk, scale=scale)

    # TODO(synk): a lane-dense (B, T, C) output (in-kernel (hb,tq,hd)->(tq,hb*hd)
    # relayout at finalize) would turn the hd-wide masked stores into unmasked
    # ones; kept head-major here so c_proj can consume it with zero transposes.
    return pl.pallas_call(
        kernel,
        out_shape=jax.ShapeDtypeStruct((B, H, T, hd), qkv.dtype),
        grid_spec=pltpu.PrefetchScalarGridSpec(
            num_scalar_prefetch=2,
            grid=(B, G, n_sched),
            in_specs=[
                pl.BlockSpec((None, hb, tq, hd), q_map),
                pl.BlockSpec((None, hb, tk, hd), k_map),
                pl.BlockSpec((None, hb, tk, hd), v_map),
            ],
            out_specs=pl.BlockSpec((None, hb, tq, hd), q_map),
            scratch_shapes=[
                pltpu.VMEM((hb, tq, 1), jnp.float32),    # m: running row max
                pltpu.VMEM((hb, tq, 1), jnp.float32),    # l: running denominator
                pltpu.VMEM((hb, tq, hd), jnp.float32),   # acc: unnormalized out
            ]),
        compiler_params=pltpu.CompilerParams(
            dimension_semantics=("parallel", "parallel", "arbitrary"),
            vmem_limit_bytes=_VMEM_LIMIT_BYTES),
    )(qi_sched, ki_sched, qkv, qkv, qkv)


# ----------------------------------------------------------------------------
# Kernel 3: output projection consuming the head-major attention output.
#   y (B, H, T, hd) x w_proj (H, hd, C) summed over heads (K axis) + bias
#   -> (B, T, C), lane-dense output stores.
# ----------------------------------------------------------------------------
def _out_proj_kernel(y_ref, w_ref, b_ref, o_ref, acc_ref, *, head_block):
    h = pl.program_id(3)

    @pl.when(h == 0)
    def _init():
        acc_ref[...] = jnp.zeros(acc_ref.shape, jnp.float32)

    acc = acc_ref[...]
    for hh in range(head_block):             # static unrolled loop over heads
        acc = acc + jnp.dot(y_ref[hh], w_ref[hh],
                            preferred_element_type=jnp.float32)
    acc_ref[...] = acc

    @pl.when(h == pl.num_programs(3) - 1)
    def _finalize():
        o_ref[...] = (acc_ref[...] + b_ref[...].astype(jnp.float32)
                      ).astype(o_ref.dtype)


def pallas_out_projection(y_heads, w_proj, b_proj, head_block):
    B, H, T, hd = y_heads.shape
    C = w_proj.shape[-1]
    hbk = head_block
    itemsize = jnp.dtype(y_heads.dtype).itemsize
    tn = _pick_lane_tile(C, 512)
    max_rows = _rows_for_budget(
        _LINEAR_BLOCK_BUDGET,
        fixed_bytes=(hbk * hd * tn + tn) * itemsize,
        per_row_bytes=hbk * hd * itemsize + tn * itemsize + tn * 4)
    tm = _pick_tile(T, min(512, max_rows))

    kernel = functools.partial(_out_proj_kernel, head_block=hbk)

    return pl.pallas_call(
        kernel,
        out_shape=jax.ShapeDtypeStruct((B, T, C), y_heads.dtype),
        grid=(B, T // tm, C // tn, H // hbk),
        in_specs=[
            pl.BlockSpec((None, hbk, tm, hd), lambda b, i, j, h: (b, h, i, 0)),
            pl.BlockSpec((hbk, hd, tn), lambda b, i, j, h: (h, 0, j)),
            pl.BlockSpec((1, tn), lambda b, i, j, h: (0, j)),
        ],
        out_specs=pl.BlockSpec((None, tm, tn), lambda b, i, j, h: (b, i, j)),
        scratch_shapes=[pltpu.VMEM((tm, tn), jnp.float32)],
        compiler_params=pltpu.CompilerParams(
            dimension_semantics=("parallel", "parallel", "parallel", "arbitrary"),
            vmem_limit_bytes=_VMEM_LIMIT_BYTES),
    )(y_heads, w_proj, b_proj)


# ----------------------------------------------------------------------------
# Full module forward: every activation-touching op is a Pallas kernel; the
# only JAX-level work is the one-time weight relayout done in _make_params.
# ----------------------------------------------------------------------------
def causal_self_attention_forward(x, params, n_head, *, block_q=None, block_k=None):
    B, T, C = x.shape
    hd = C // n_head
    hb = _pick_head_block(n_head, hd)

    # c_attn, written head-major so downstream kernels need no relayout.
    qkv = pallas_qkv_projection(x, params["w_qkv"], params["b_qkv"])     # (B,3H,T,hd)

    # Flash attention over the lower-triangular tile schedule.
    y_heads = pallas_causal_attention(qkv, n_head, hb,
                                      block_q=block_q, block_k=block_k)  # (B,H,T,hd)

    # c_proj; attn/resid dropout are identity at p = 0 (inference semantics).
    # TODO(synk): training-mode dropout (stateful PRNG masks) not implemented.
    return pallas_out_projection(y_heads, params["w_proj"], params["b_proj"], hb)


# ----------------------------------------------------------------------------
# Pure-JAX reference for verification (high-precision matmuls)
# ----------------------------------------------------------------------------
def reference_forward(x, params, n_head):
    hp = jax.lax.Precision.HIGHEST
    B, T, C = x.shape
    hd = C // n_head
    qkv = jnp.dot(x, params["w_attn"].T, precision=hp) + params["b_attn"]
    q, k, v = jnp.split(qkv, 3, axis=2)
    q = q.reshape(B, T, n_head, hd).transpose(0, 2, 1, 3)
    k = k.reshape(B, T, n_head, hd).transpose(0, 2, 1, 3)
    v = v.reshape(B, T, n_head, hd).transpose(0, 2, 1, 3)
    att = jnp.einsum("bhqd,bhkd->bhqk", q, k, precision=hp) / math.sqrt(hd)
    mask = jnp.tril(jnp.ones((T, T), dtype=bool))
    att = jnp.where(mask[None, None], att, -jnp.inf)
    att = jax.nn.softmax(att, axis=-1)
    y = jnp.einsum("bhqk,bhkd->bhqd", att, v, precision=hp)
    y = y.transpose(0, 2, 1, 3).reshape(B, T, C)
    return jnp.dot(y, params["w_proj"].T, precision=hp) + params["b_proj"]


# ----------------------------------------------------------------------------
# Parameter construction (canonical nn.Linear layout + kernel layout)
# ----------------------------------------------------------------------------
def _make_params(key, C, n_head):
    hd = C // n_head
    kwa, kba, kwp, kbp = jax.random.split(key, 4)
    # nn.Linear weights are (out, in); biases are (out,).
    w_attn = 0.02 * jax.random.normal(kwa, (3 * C, C), dtype=jnp.float32)
    b_attn = 0.01 * jax.random.normal(kba, (3 * C,), dtype=jnp.float32)
    w_proj = 0.02 * jax.random.normal(kwp, (C, C), dtype=jnp.float32)
    b_proj = 0.01 * jax.random.normal(kbp, (C,), dtype=jnp.float32)

    canonical = dict(w_attn=w_attn, b_attn=b_attn, w_proj=w_proj, b_proj=b_proj)

    # One-time weight relayout for the kernel-side head-major layout:
    #   w_qkv[j] = (C, hd) block producing packed-output feature block j, j in [0, 3H)
    w_qkv = w_attn.T.reshape(C, 3 * n_head, hd).transpose(1, 0, 2)     # (3H, C, hd)
    b_qkv = b_attn.reshape(3 * n_head, 1, hd)                          # (3H, 1, hd)
    w_proj_h = w_proj.T.reshape(n_head, hd, C)                         # (H, hd, C)
    b_proj_k = b_proj.reshape(1, C)                                    # (1, C)
    kernel_params = dict(w_qkv=w_qkv, b_qkv=b_qkv, w_proj=w_proj_h, b_proj=b_proj_k)
    return canonical, kernel_params


# ----------------------------------------------------------------------------
# Test harness
# ----------------------------------------------------------------------------
def _run_case(B, T, C, n_head, block_q=None, block_k=None):
    key = jax.random.PRNGKey(0)
    kx, kp = jax.random.split(key)
    x = jax.random.normal(kx, (B, T, C), dtype=jnp.float32)
    canonical, kparams = _make_params(kp, C, n_head)

    fwd = jax.jit(functools.partial(
        causal_self_attention_forward, n_head=n_head,
        block_q=block_q, block_k=block_k))
    y = fwd(x, kparams)
    jax.block_until_ready(y)

    y_ref = reference_forward(x, canonical, n_head)
    assert y.shape == (B, T, C)
    err = float(jnp.max(jnp.abs(y - y_ref)))
    # Tolerance accommodates MXU accumulation-order / precision differences.
    assert jnp.allclose(y, y_ref, atol=2e-3, rtol=2e-3), (
        f"mismatch vs reference (B={B}, T={T}, C={C}, H={n_head}): "
        f"max_abs_err={err}")
    return err


if __name__ == "__main__":
    # Small config consistent with the module: B=2, T=8, C=32, n_head=4.
    _run_case(B=2, T=8, C=32, n_head=4)
    # Larger configs exercising the triangular tile schedule, head-grouped
    # flash attention, and the head-K-tiled output projection.
    _run_case(B=1, T=1024, C=128, n_head=2)
    _run_case(B=1, T=512, C=128, n_head=4, block_q=128, block_k=128)
    print("KERNEL_OK")
</pallas_src>

<mosaic_0001>
module attributes {stable_mosaic.version = 11 : i64} {
  func.func @_flash_causal_kernel(%arg0: i32, %arg1: i32, %arg2: i32, %arg3: memref<1xi32, #tpu.memory_space<smem>>, %arg4: memref<1xi32, #tpu.memory_space<smem>>, %arg5: memref<1x4x8x8xf32, #tpu.memory_space<vmem>>, %arg6: memref<1x4x8x8xf32, #tpu.memory_space<vmem>>, %arg7: memref<1x4x8x8xf32, #tpu.memory_space<vmem>>, %arg8: memref<1x4x8x8xf32, #tpu.memory_space<vmem>>, %arg9: memref<4x8x1xf32, #tpu.memory_space<vmem>>, %arg10: memref<4x8x1xf32, #tpu.memory_space<vmem>>, %arg11: memref<4x8x8xf32, #tpu.memory_space<vmem>>) attributes {dimension_semantics = [#tpu.dimension_semantics<parallel>, #tpu.dimension_semantics<parallel>, #tpu.dimension_semantics<arbitrary>], iteration_bounds = array<i64: 2, 1, 1>, scalar_prefetch = 2 : i64, scratch_operands = 3 : i64, tpu.core_type = #tpu.core_type<tc>, window_params = [{transform_indices = @transform_0, window_bounds = array<i64: 1, 4, 8, 8>}, {transform_indices = @transform_1, window_bounds = array<i64: 1, 4, 8, 8>}, {transform_indices = @transform_2, window_bounds = array<i64: 1, 4, 8, 8>}, {transform_indices = @transform_3, window_bounds = array<i64: 1, 4, 8, 8>}]} {
    %0 = arith.index_cast %arg2 : i32 to index
    %1 = memref.load %arg3[%0] : memref<1xi32, #tpu.memory_space<smem>>
    %2 = arith.index_cast %arg2 : i32 to index
    %3 = memref.load %arg4[%2] : memref<1xi32, #tpu.memory_space<smem>>
    %c8_i32 = arith.constant 8 : i32
    %4 = arith.muli %1, %c8_i32 : i32
    %c8_i32_0 = arith.constant 8 : i32
    %5 = arith.muli %3, %c8_i32_0 : i32
    %c0_i32 = arith.constant 0 : i32
    %6 = arith.cmpi eq, %3, %c0_i32 : i32
    %7 = arith.extui %6 : i1 to i32
    %c0_i32_1 = arith.constant 0 : i32
    %8 = arith.cmpi ne, %7, %c0_i32_1 : i32
    scf.if %8 {
      %cst_19 = arith.constant -1.000000e+30 : f32
      %30 = vector.broadcast %cst_19 : f32 to vector<4x8x1xf32>
      %c0_20 = arith.constant 0 : index
      %c0_21 = arith.constant 0 : index
      %c0_22 = arith.constant 0 : index
      %31 = vector.load %arg9[%c0_20, %c0_21, %c0_22] : memref<4x8x1xf32, #tpu.memory_space<vmem>>, vector<4x8x1xf32>
      tpu.vector_store %arg9[%c0_20, %c0_21, %c0_22], %30 {strides = array<i32>} : memref<4x8x1xf32, #tpu.memory_space<vmem>>, vector<4x8x1xf32>,
      %cst_23 = arith.constant 0.000000e+00 : f32
      %32 = vector.broadcast %cst_23 : f32 to vector<4x8x1xf32>
      %c0_24 = arith.constant 0 : index
      %c0_25 = arith.constant 0 : index
      %c0_26 = arith.constant 0 : index
      %33 = vector.load %arg10[%c0_24, %c0_25, %c0_26] : memref<4x8x1xf32, #tpu.memory_space<vmem>>, vector<4x8x1xf32>
      tpu.vector_store %arg10[%c0_24, %c0_25, %c0_26], %32 {strides = array<i32>} : memref<4x8x1xf32, #tpu.memory_space<vmem>>, vector<4x8x1xf32>,
      %cst_27 = arith.constant 0.000000e+00 : f32
      %34 = vector.broadcast %cst_27 : f32 to vector<4x8x8xf32>
      %c0_28 = arith.constant 0 : index
      %c0_29 = arith.constant 0 : index
      %c0_30 = arith.constant 0 : index
      %35 = vector.load %arg11[%c0_28, %c0_29, %c0_30] : memref<4x8x8xf32, #tpu.memory_space<vmem>>, vector<4x8x8xf32>
      tpu.vector_store %arg11[%c0_28, %c0_29, %c0_30], %34 {strides = array<i32>} : memref<4x8x8xf32, #tpu.memory_space<vmem>>, vector<4x8x8xf32>,
    } else {
    }
    %c0 = arith.constant 0 : index
    %c0_2 = arith.constant 0 : index
    %c0_3 = arith.constant 0 : index
    %c0_4 = arith.constant 0 : index
    %9 = vector.load %arg5[%c0, %c0_2, %c0_3, %c0_4] : memref<1x4x8x8xf32, #tpu.memory_space<vmem>>, vector<1x4x8x8xf32>
    %10 = vector.shape_cast %9 : vector<1x4x8x8xf32> to vector<4x8x8xf32>
    %cst = arith.constant 0.353553385 : f32
    %11 = vector.broadcast %cst : f32 to vector<4x8x8xf32>
    %12 = arith.mulf %10, %11 : vector<4x8x8xf32>
    %c0_5 = arith.constant 0 : index
    %c0_6 = arith.constant 0 : index
    %c0_7 = arith.constant 0 : index
    %c0_8 = arith.constant 0 : index
    %13 = vector.load %arg6[%c0_5, %c0_6, %c0_7, %c0_8] : memref<1x4x8x8xf32, #tpu.memory_space<vmem>>, vector<1x4x8x8xf32>
    %14 = vector.shape_cast %13 : vector<1x4x8x8xf32> to vector<4x8x8xf32>
    %c0_9 = arith.constant 0 : index
    %c0_10 = arith.constant 0 : index
    %c0_11 = arith.constant 0 : index
    %c0_12 = arith.constant 0 : index
    %15 = vector.load %arg7[%c0_9, %c0_10, %c0_11, %c0_12] : memref<1x4x8x8xf32, #tpu.memory_space<vmem>>, vector<1x4x8x8xf32>
    %16 = vector.shape_cast %15 : vector<1x4x8x8xf32> to vector<4x8x8xf32>
    %c8_i32_13 = arith.constant 8 : i32
    %17 = arith.addi %5, %c8_i32_13 : i32
    %c1_i32 = arith.constant 1 : i32
    %18 = arith.addi %4, %c1_i32 : i32
    %19 = arith.cmpi sgt, %17, %18 : i32
    %20 = arith.extui %19 : i1 to i32
    %c0_i32_14 = arith.constant 0 : i32
    %21 = arith.cmpi ne, %20, %c0_i32_14 : i32
    scf.if %21 {
      "tpu.trace_start"() <{level = 10 : i32, message = "hqd,hkd->hqk"}> : () -> ()
      %cst_19 = arith.constant dense<0.000000e+00> : vector<4x8x8xf32>
      %30 = tpu.matmul %12, %14, %cst_19 {dimension_numbers = #tpu.dot_dimension_numbers<[2], [2], [1], [1], [0, 0, 0, 1, 1, 1], [0], [0]>} : vector<4x8x8xf32>, vector<4x8x8xf32>, vector<4x8x8xf32> -> vector<4x8x8xf32>
      "tpu.trace_stop"() : () -> ()
      %31 = tpu.iota {dimensions = array<i32: 1>} : vector<4x8x8xi32>
      %32 = vector.broadcast %4 : i32 to vector<4x8x8xi32>
      %33 = arith.addi %32, %31 : vector<4x8x8xi32>
      %34 = tpu.iota {dimensions = array<i32: 2>} : vector<4x8x8xi32>
      %35 = vector.broadcast %5 : i32 to vector<4x8x8xi32>
      %36 = arith.addi %35, %34 : vector<4x8x8xi32>
      %37 = arith.cmpi sle, %36, %33 : vector<4x8x8xi32>
      %cst_20 = arith.constant -1.000000e+30 : f32
      %38 = vector.broadcast %cst_20 : f32 to vector<4x8x8xf32>
      %39 = arith.select %37, %30, %38 : vector<4x8x8xi1>, vector<4x8x8xf32>
      %c0_21 = arith.constant 0 : index
      %c0_22 = arith.constant 0 : index
      %c0_23 = arith.constant 0 : index
      %40 = vector.load %arg9[%c0_21, %c0_22, %c0_23] : memref<4x8x1xf32, #tpu.memory_space<vmem>>, vector<4x8x1xf32>
      %cst_24 = arith.constant dense<0xFF800000> : vector<4x8xf32>
      %41 = vector.multi_reduction <maximumf>, %39, %cst_24 [2] : vector<4x8x8xf32> to vector<4x8xf32>
      %42 = vector.shape_cast %41 : vector<4x8xf32> to vector<4x8x1xf32>
      %43 = arith.maximumf %40, %42 : vector<4x8x1xf32>
      %44 = arith.subf %40, %43 : vector<4x8x1xf32>
      %45 = math.exp %44 : vector<4x8x1xf32>
      %46 = vector.broadcast %43 : vector<4x8x1xf32> to vector<4x8x8xf32>
      %47 = arith.subf %39, %46 : vector<4x8x8xf32>
      %48 = math.exp %47 : vector<4x8x8xf32>
      %c0_25 = arith.constant 0 : index
      %c0_26 = arith.constant 0 : index
      %c0_27 = arith.constant 0 : index
      %49 = vector.load %arg10[%c0_25, %c0_26, %c0_27] : memref<4x8x1xf32, #tpu.memory_space<vmem>>, vector<4x8x1xf32>
      %50 = arith.mulf %45, %49 : vector<4x8x1xf32>
      %cst_28 = arith.constant dense<0.000000e+00> : vector<4x8xf32>
      %51 = vector.multi_reduction <add>, %48, %cst_28 [2] : vector<4x8x8xf32> to vector<4x8xf32>
      %52 = vector.shape_cast %51 : vector<4x8xf32> to vector<4x8x1xf32>
      %53 = arith.addf %50, %52 : vector<4x8x1xf32>
      %c0_29 = arith.constant 0 : index
      %c0_30 = arith.constant 0 : index
      %c0_31 = arith.constant 0 : index
      %54 = vector.load %arg10[%c0_29, %c0_30, %c0_31] : memref<4x8x1xf32, #tpu.memory_space<vmem>>, vector<4x8x1xf32>
      tpu.vector_store %arg10[%c0_29, %c0_30, %c0_31], %53 {strides = array<i32>} : memref<4x8x1xf32, #tpu.memory_space<vmem>>, vector<4x8x1xf32>,
      %c0_32 = arith.constant 0 : index
      %c0_33 = arith.constant 0 : index
      %c0_34 = arith.constant 0 : index
      %55 = vector.load %arg11[%c0_32, %c0_33, %c0_34] : memref<4x8x8xf32, #tpu.memory_space<vmem>>, vector<4x8x8xf32>
      %56 = vector.broadcast %45 : vector<4x8x1xf32> to vector<4x8x8xf32>
      %57 = arith.mulf %56, %55 : vector<4x8x8xf32>
      "tpu.trace_start"() <{level = 10 : i32, message = "hqk,hkd->hqd"}> : () -> ()
      %cst_35 = arith.constant dense<0.000000e+00> : vector<4x8x8xf32>
      %58 = tpu.matmul %48, %16, %cst_35 {dimension_numbers = #tpu.dot_dimension_numbers<[2], [1], [1], [2], [0, 0, 0, 1, 1, 2], [0], [0]>} : vector<4x8x8xf32>, vector<4x8x8xf32>, vector<4x8x8xf32> -> vector<4x8x8xf32>
      "tpu.trace_stop"() : () -> ()
      %59 = arith.addf %57, %58 : vector<4x8x8xf32>
      %c0_36 = arith.constant 0 : index
      %c0_37 = arith.constant 0 : index
      %c0_38 = arith.constant 0 : index
      %60 = vector.load %arg11[%c0_36, %c0_37, %c0_38] : memref<4x8x8xf32, #tpu.memory_space<vmem>>, vector<4x8x8xf32>
      tpu.vector_store %arg11[%c0_36, %c0_37, %c0_38], %59 {strides = array<i32>} : memref<4x8x8xf32, #tpu.memory_space<vmem>>, vector<4x8x8xf32>,
      %c0_39 = arith.constant 0 : index
      %c0_40 = arith.constant 0 : index
      %c0_41 = arith.constant 0 : index
      %61 = vector.load %arg9[%c0_39, %c0_40, %c0_41] : memref<4x8x1xf32, #tpu.memory_space<vmem>>, vector<4x8x1xf32>
      tpu.vector_store %arg9[%c0_39, %c0_40, %c0_41], %43 {strides = array<i32>} : memref<4x8x1xf32, #tpu.memory_space<vmem>>, vector<4x8x1xf32>,
    } else {
    }
    %true = arith.constant true
    %22 = arith.xori %19, %true : i1
    %23 = arith.extui %22 : i1 to i32
    %c0_i32_15 = arith.constant 0 : i32
    %24 = arith.cmpi ne, %23, %c0_i32_15 : i32
    scf.if %24 {
      "tpu.trace_start"() <{level = 10 : i32, message = "hqd,hkd->hqk"}> : () -> ()
      %cst_19 = arith.constant dense<0.000000e+00> : vector<4x8x8xf32>
      %30 = tpu.matmul %12, %14, %cst_19 {dimension_numbers = #tpu.dot_dimension_numbers<[2], [2], [1], [1], [0, 0, 0, 1, 1, 1], [0], [0]>} : vector<4x8x8xf32>, vector<4x8x8xf32>, vector<4x8x8xf32> -> vector<4x8x8xf32>
      "tpu.trace_stop"() : () -> ()
      %c0_20 = arith.constant 0 : index
      %c0_21 = arith.constant 0 : index
      %c0_22 = arith.constant 0 : index
      %31 = vector.load %arg9[%c0_20, %c0_21, %c0_22] : memref<4x8x1xf32, #tpu.memory_space<vmem>>, vector<4x8x1xf32>
      %cst_23 = arith.constant dense<0xFF800000> : vector<4x8xf32>
      %32 = vector.multi_reduction <maximumf>, %30, %cst_23 [2] : vector<4x8x8xf32> to vector<4x8xf32>
      %33 = vector.shape_cast %32 : vector<4x8xf32> to vector<4x8x1xf32>
      %34 = arith.maximumf %31, %33 : vector<4x8x1xf32>
      %35 = arith.subf %31, %34 : vector<4x8x1xf32>
      %36 = math.exp %35 : vector<4x8x1xf32>
      %37 = vector.broadcast %34 : vector<4x8x1xf32> to vector<4x8x8xf32>
      %38 = arith.subf %30, %37 : vector<4x8x8xf32>
      %39 = math.exp %38 : vector<4x8x8xf32>
      %c0_24 = arith.constant 0 : index
      %c0_25 = arith.constant 0 : index
      %c0_26 = arith.constant 0 : index
      %40 = vector.load %arg10[%c0_24, %c0_25, %c0_26] : memref<4x8x1xf32, #tpu.memory_space<vmem>>, vector<4x8x1xf32>
      %41 = arith.mulf %36, %40 : vector<4x8x1xf32>
      %cst_27 = arith.constant dense<0.000000e+00> : vector<4x8xf32>
      %42 = vector.multi_reduction <add>, %39, %cst_27 [2] : vector<4x8x8xf32> to vector<4x8xf32>
      %43 = vector.shape_cast %42 : vector<4x8xf32> to vector<4x8x1xf32>
      %44 = arith.addf %41, %43 : vector<4x8x1xf32>
      %c0_28 = arith.constant 0 : index
      %c0_29 = arith.constant 0 : index
      %c0_30 = arith.constant 0 : index
      %45 = vector.load %arg10[%c0_28, %c0_29, %c0_30] : memref<4x8x1xf32, #tpu.memory_space<vmem>>, vector<4x8x1xf32>
      tpu.vector_store %arg10[%c0_28, %c0_29, %c0_30], %44 {strides = array<i32>} : memref<4x8x1xf32, #tpu.memory_space<vmem>>, vector<4x8x1xf32>,
      %c0_31 = arith.constant 0 : index
      %c0_32 = arith.constant 0 : index
      %c0_33 = arith.constant 0 : index
      %46 = vector.load %arg11[%c0_31, %c0_32, %c0_33] : memref<4x8x8xf32, #tpu.memory_space<vmem>>, vector<4x8x8xf32>
      %47 = vector.broadcast %36 : vector<4x8x1xf32> to vector<4x8x8xf32>
      %48 = arith.mulf %47, %46 : vector<4x8x8xf32>
      "tpu.trace_start"() <{level = 10 : i32, message = "hqk,hkd->hqd"}> : () -> ()
      %cst_34 = arith.constant dense<0.000000e+00> : vector<4x8x8xf32>
      %49 = tpu.matmul %39, %16, %cst_34 {dimension_numbers = #tpu.dot_dimension_numbers<[2], [1], [1], [2], [0, 0, 0, 1, 1, 2], [0], [0]>} : vector<4x8x8xf32>, vector<4x8x8xf32>, vector<4x8x8xf32> -> vector<4x8x8xf32>
      "tpu.trace_stop"() : () -> ()
      %50 = arith.addf %48, %49 : vector<4x8x8xf32>
      %c0_35 = arith.constant 0 : index
      %c0_36 = arith.constant 0 : index
      %c0_37 = arith.constant 0 : index
      %51 = vector.load %arg11[%c0_35, %c0_36, %c0_37] : memref<4x8x8xf32, #tpu.memory_space<vmem>>, vector<4x8x8xf32>
      tpu.vector_store %arg11[%c0_35, %c0_36, %c0_37], %50 {strides = array<i32>} : memref<4x8x8xf32, #tpu.memory_space<vmem>>, vector<4x8x8xf32>,
      %c0_38 = arith.constant 0 : index
      %c0_39 = arith.constant 0 : index
      %c0_40 = arith.constant 0 : index
      %52 = vector.load %arg9[%c0_38, %c0_39, %c0_40] : memref<4x8x1xf32, #tpu.memory_space<vmem>>, vector<4x8x1xf32>
      tpu.vector_store %arg9[%c0_38, %c0_39, %c0_40], %34 {strides = array<i32>} : memref<4x8x1xf32, #tpu.memory_space<vmem>>, vector<4x8x1xf32>,
    } else {
    }
    %c8_i32_16 = arith.constant 8 : i32
    %25 = arith.addi %5, %c8_i32_16 : i32
    %c8_i32_17 = arith.constant 8 : i32
    %26 = arith.addi %4, %c8_i32_17 : i32
    %27 = arith.cmpi sge, %25, %26 : i32
    %28 = arith.extui %27 : i1 to i32
    %c0_i32_18 = arith.constant 0 : i32
    %29 = arith.cmpi ne, %28, %c0_i32_18 : i32
    scf.if %29 {
      %c0_19 = arith.constant 0 : index
      %c0_20 = arith.constant 0 : index
      %c0_21 = arith.constant 0 : index
      %30 = vector.load %arg10[%c0_19, %c0_20, %c0_21] : memref<4x8x1xf32, #tpu.memory_space<vmem>>, vector<4x8x1xf32>
      %31 = tpu.reciprocal %30 {approx = true} : vector<4x8x1xf32> -> vector<4x8x1xf32>
      %32 = arith.mulf %30, %31 : vector<4x8x1xf32>
      %cst_22 = arith.constant 2.000000e+00 : f32
      %33 = vector.broadcast %cst_22 : f32 to vector<4x8x1xf32>
      %34 = arith.subf %33, %32 : vector<4x8x1xf32>
      %35 = arith.mulf %31, %34 : vector<4x8x1xf32>
      %c0_23 = arith.constant 0 : index
      %c0_24 = arith.constant 0 : index
      %c0_25 = arith.constant 0 : index
      %36 = vector.load %arg11[%c0_23, %c0_24, %c0_25] : memref<4x8x8xf32, #tpu.memory_space<vmem>>, vector<4x8x8xf32>
      %37 = vector.broadcast %35 : vector<4x8x1xf32> to vector<4x8x8xf32>
      %38 = arith.mulf %36, %37 : vector<4x8x8xf32>
      %c0_26 = arith.constant 0 : index
      %c0_27 = arith.constant 0 : index
      %c0_28 = arith.constant 0 : index
      %c0_29 = arith.constant 0 : index
      %39 = vector.load %arg8[%c0_26, %c0_27, %c0_28, %c0_29] : memref<1x4x8x8xf32, #tpu.memory_space<vmem>>, vector<1x4x8x8xf32>
      %40 = vector.shape_cast %39 : vector<1x4x8x8xf32> to vector<4x8x8xf32>
      %41 = vector.shape_cast %38 : vector<4x8x8xf32> to vector<1x4x8x8xf32>
      tpu.vector_store %arg8[%c0_26, %c0_27, %c0_28, %c0_29], %41 {strides = array<i32>} : memref<1x4x8x8xf32, #tpu.memory_space<vmem>>, vector<1x4x8x8xf32>,
    } else {
    }
    return
  }
  func.func @transform_0(%arg0: i32, %arg1: i32, %arg2: i32, %arg3: memref<1xi32, #tpu.memory_space<smem>>, %arg4: memref<1xi32, #tpu.memory_space<smem>>) -> (i32, i32, i32, i32) {
    %0 = arith.index_cast %arg2 : i32 to index
    %1 = memref.load %arg3[%0] : memref<1xi32, #tpu.memory_space<smem>>
    %c0_i32 = arith.constant 0 : i32
    %c0_i32_0 = arith.constant 0 : i32
    return %arg0, %arg1, %1, %c0_i32 : i32, i32, i32, i32
  }
  func.func @transform_1(%arg0: i32, %arg1: i32, %arg2: i32, %arg3: memref<1xi32, #tpu.memory_space<smem>>, %arg4: memref<1xi32, #tpu.memory_space<smem>>) -> (i32, i32, i32, i32) {
    %c1_i32 = arith.constant 1 : i32
    %0 = arith.addi %c1_i32, %arg1 : i32
    %1 = arith.index_cast %arg2 : i32 to index
    %2 = memref.load %arg4[%1] : memref<1xi32, #tpu.memory_space<smem>>
    %c0_i32 = arith.constant 0 : i32
    %c0_i32_0 = arith.constant 0 : i32
    return %arg0, %0, %2, %c0_i32 : i32, i32, i32, i32
  }
  func.func @transform_2(%arg0: i32, %arg1: i32, %arg2: i32, %arg3: memref<1xi32, #tpu.memory_space<smem>>, %arg4: memref<1xi32, #tpu.memory_space<smem>>) -> (i32, i32, i32, i32) {
    %c2_i32 = arith.constant 2 : i32
    %0 = arith.addi %c2_i32, %arg1 : i32
    %1 = arith.index_cast %arg2 : i32 to index
    %2 = memref.load %arg4[%1] : memref<1xi32, #tpu.memory_space<smem>>
    %c0_i32 = arith.constant 0 : i32
    %c0_i32_0 = arith.constant 0 : i32
    return %arg0, %0, %2, %c0_i32 : i32, i32, i32, i32
  }
  func.func @transform_3(%arg0: i32, %arg1: i32, %arg2: i32, %arg3: memref<1xi32, #tpu.memory_space<smem>>, %arg4: memref<1xi32, #tpu.memory_space<smem>>) -> (i32, i32, i32, i32) {
    %0 = arith.index_cast %arg2 : i32 to index
    %1 = memref.load %arg3[%0] : memref<1xi32, #tpu.memory_space<smem>>
    %c0_i32 = arith.constant 0 : i32
    %c0_i32_0 = arith.constant 0 : i32
    return %arg0, %arg1, %1, %c0_i32 : i32, i32, i32, i32
  }
}

module attributes {stable_mosaic.version = 11 : i64} {
  func.func @_qkv_proj_kernel(%arg0: i32, %arg1: i32, %arg2: i32, %arg3: memref<1x8x32xf32, #tpu.memory_space<vmem>>, %arg4: memref<1x32x8xf32, #tpu.memory_space<vmem>>, %arg5: memref<1x1x8xf32, #tpu.memory_space<vmem>>, %arg6: memref<1x1x8x8xf32, #tpu.memory_space<vmem>>) attributes {dimension_semantics = [#tpu.dimension_semantics<parallel>, #tpu.dimension_semantics<parallel>, #tpu.dimension_semantics<parallel>], iteration_bounds = array<i64: 2, 1, 12>, scalar_prefetch = 0 : i64, scratch_operands = 0 : i64, tpu.core_type = #tpu.core_type<tc>, window_params = [{transform_indices = @transform_0, window_bounds = array<i64: 1, 8, 32>}, {transform_indices = @transform_1, window_bounds = array<i64: 1, 32, 8>}, {transform_indices = @transform_2, window_bounds = array<i64: 1, 1, 8>}, {transform_indices = @transform_3, window_bounds = array<i64: 1, 1, 8, 8>}]} {
    %c0 = arith.constant 0 : index
    %c0_0 = arith.constant 0 : index
    %c0_1 = arith.constant 0 : index
    %0 = vector.load %arg3[%c0, %c0_0, %c0_1] : memref<1x8x32xf32, #tpu.memory_space<vmem>>, vector<1x8x32xf32>
    %1 = vector.shape_cast %0 : vector<1x8x32xf32> to vector<8x32xf32>
    %c0_2 = arith.constant 0 : index
    %c0_3 = arith.constant 0 : index
    %c0_4 = arith.constant 0 : index
    %2 = vector.load %arg4[%c0_2, %c0_3, %c0_4] : memref<1x32x8xf32, #tpu.memory_space<vmem>>, vector<1x32x8xf32>
    %3 = vector.shape_cast %2 : vector<1x32x8xf32> to vector<32x8xf32>
    %cst = arith.constant dense<0.000000e+00> : vector<8x8xf32>
    %4 = tpu.matmul %1, %3, %cst {dimension_numbers = #tpu.dot_dimension_numbers<[1], [0], [0], [1], [0, 0, 1, 1], [], []>} : vector<8x32xf32>, vector<32x8xf32>, vector<8x8xf32> -> vector<8x8xf32>
    %c0_5 = arith.constant 0 : index
    %c0_6 = arith.constant 0 : index
    %c0_7 = arith.constant 0 : index
    %5 = vector.load %arg5[%c0_5, %c0_6, %c0_7] : memref<1x1x8xf32, #tpu.memory_space<vmem>>, vector<1x1x8xf32>
    %6 = vector.shape_cast %5 : vector<1x1x8xf32> to vector<1x8xf32>
    %7 = vector.broadcast %6 : vector<1x8xf32> to vector<8x8xf32>
    %8 = arith.addf %4, %7 : vector<8x8xf32>
    %c0_8 = arith.constant 0 : index
    %c0_9 = arith.constant 0 : index
    %c0_10 = arith.constant 0 : index
    %c0_11 = arith.constant 0 : index
    %9 = vector.load %arg6[%c0_8, %c0_9, %c0_10, %c0_11] : memref<1x1x8x8xf32, #tpu.memory_space<vmem>>, vector<1x1x8x8xf32>
    %10 = vector.shape_cast %9 : vector<1x1x8x8xf32> to vector<8x8xf32>
    %11 = vector.shape_cast %8 : vector<8x8xf32> to vector<1x1x8x8xf32>
    tpu.vector_store %arg6[%c0_8, %c0_9, %c0_10, %c0_11], %11 {strides = array<i32>} : memref<1x1x8x8xf32, #tpu.memory_space<vmem>>, vector<1x1x8x8xf32>,
    return
  }
  func.func @transform_0(%arg0: i32, %arg1: i32, %arg2: i32) -> (i32, i32, i32) {
    %c0_i32 = arith.constant 0 : i32
    %c0_i32_0 = arith.constant 0 : i32
    return %arg0, %arg1, %c0_i32 : i32, i32, i32
  }
  func.func @transform_1(%arg0: i32, %arg1: i32, %arg2: i32) -> (i32, i32, i32) {
    %c0_i32 = arith.constant 0 : i32
    %c0_i32_0 = arith.constant 0 : i32
    %c0_i32_1 = arith.constant 0 : i32
    return %arg2, %c0_i32, %c0_i32_0 : i32, i32, i32
  }
  func.func @transform_2(%arg0: i32, %arg1: i32, %arg2: i32) -> (i32, i32, i32) {
    %c0_i32 = arith.constant 0 : i32
    %c0_i32_0 = arith.constant 0 : i32
    %c0_i32_1 = arith.constant 0 : i32
    return %arg2, %c0_i32, %c0_i32_0 : i32, i32, i32
  }
  func.func @transform_3(%arg0: i32, %arg1: i32, %arg2: i32) -> (i32, i32, i32, i32) {
    %c0_i32 = arith.constant 0 : i32
    %c0_i32_0 = arith.constant 0 : i32
    return %arg0, %arg2, %arg1, %c0_i32 : i32, i32, i32, i32
  }
}

module attributes {stable_mosaic.version = 11 : i64} {
  func.func @_out_proj_kernel(%arg0: i32, %arg1: i32, %arg2: i32, %arg3: i32, %arg4: memref<1x4x8x8xf32, #tpu.memory_space<vmem>>, %arg5: memref<4x8x32xf32, #tpu.memory_space<vmem>>, %arg6: memref<1x32xf32, #tpu.memory_space<vmem>>, %arg7: memref<1x8x32xf32, #tpu.memory_space<vmem>>, %arg8: memref<8x32xf32, #tpu.memory_space<vmem>>) attributes {dimension_semantics = [#tpu.dimension_semantics<parallel>, #tpu.dimension_semantics<parallel>, #tpu.dimension_semantics<parallel>, #tpu.dimension_semantics<arbitrary>], iteration_bounds = array<i64: 2, 1, 1, 1>, scalar_prefetch = 0 : i64, scratch_operands = 1 : i64, tpu.core_type = #tpu.core_type<tc>, window_params = [{transform_indices = @transform_0, window_bounds = array<i64: 1, 4, 8, 8>}, {transform_indices = @transform_1, window_bounds = array<i64: 4, 8, 32>}, {transform_indices = @transform_2, window_bounds = array<i64: 1, 32>}, {transform_indices = @transform_3, window_bounds = array<i64: 1, 8, 32>}]} {
    %c0_i32 = arith.constant 0 : i32
    %0 = arith.cmpi eq, %arg3, %c0_i32 : i32
    %1 = arith.extui %0 : i1 to i32
    %c0_i32_0 = arith.constant 0 : i32
    %2 = arith.cmpi ne, %1, %c0_i32_0 : i32
    scf.if %2 {
      %cst_34 = arith.constant 0.000000e+00 : f32
      %32 = vector.broadcast %cst_34 : f32 to vector<8x32xf32>
      %c0_35 = arith.constant 0 : index
      %c0_36 = arith.constant 0 : index
      %33 = vector.load %arg8[%c0_35, %c0_36] : memref<8x32xf32, #tpu.memory_space<vmem>>, vector<8x32xf32>
      tpu.vector_store %arg8[%c0_35, %c0_36], %32 {strides = array<i32>} : memref<8x32xf32, #tpu.memory_space<vmem>>, vector<8x32xf32>,
    } else {
    }
    %c0 = arith.constant 0 : index
    %c0_1 = arith.constant 0 : index
    %3 = vector.load %arg8[%c0, %c0_1] : memref<8x32xf32, #tpu.memory_space<vmem>>, vector<8x32xf32>
    %c0_2 = arith.constant 0 : index
    %c0_3 = arith.constant 0 : index
    %c0_4 = arith.constant 0 : index
    %c0_5 = arith.constant 0 : index
    %4 = vector.load %arg4[%c0_2, %c0_3, %c0_4, %c0_5] : memref<1x4x8x8xf32, #tpu.memory_space<vmem>>, vector<1x1x8x8xf32>
    %5 = vector.shape_cast %4 : vector<1x1x8x8xf32> to vector<8x8xf32>
    %c0_6 = arith.constant 0 : index
    %c0_7 = arith.constant 0 : index
    %c0_8 = arith.constant 0 : index
    %6 = vector.load %arg5[%c0_6, %c0_7, %c0_8] : memref<4x8x32xf32, #tpu.memory_space<vmem>>, vector<1x8x32xf32>
    %7 = vector.shape_cast %6 : vector<1x8x32xf32> to vector<8x32xf32>
    %cst = arith.constant dense<0.000000e+00> : vector<8x32xf32>
    %8 = tpu.matmul %5, %7, %cst {dimension_numbers = #tpu.dot_dimension_numbers<[1], [0], [0], [1], [0, 0, 1, 1], [], []>} : vector<8x8xf32>, vector<8x32xf32>, vector<8x32xf32> -> vector<8x32xf32>
    %9 = arith.addf %3, %8 : vector<8x32xf32>
    %c0_9 = arith.constant 0 : index
    %c1 = arith.constant 1 : index
    %c0_10 = arith.constant 0 : index
    %c0_11 = arith.constant 0 : index
    %10 = vector.load %arg4[%c0_9, %c1, %c0_10, %c0_11] : memref<1x4x8x8xf32, #tpu.memory_space<vmem>>, vector<1x1x8x8xf32>
    %11 = vector.shape_cast %10 : vector<1x1x8x8xf32> to vector<8x8xf32>
    %c1_12 = arith.constant 1 : index
    %c0_13 = arith.constant 0 : index
    %c0_14 = arith.constant 0 : index
    %12 = vector.load %arg5[%c1_12, %c0_13, %c0_14] : memref<4x8x32xf32, #tpu.memory_space<vmem>>, vector<1x8x32xf32>
    %13 = vector.shape_cast %12 : vector<1x8x32xf32> to vector<8x32xf32>
    %cst_15 = arith.constant dense<0.000000e+00> : vector<8x32xf32>
    %14 = tpu.matmul %11, %13, %cst_15 {dimension_numbers = #tpu.dot_dimension_numbers<[1], [0], [0], [1], [0, 0, 1, 1], [], []>} : vector<8x8xf32>, vector<8x32xf32>, vector<8x32xf32> -> vector<8x32xf32>
    %15 = arith.addf %9, %14 : vector<8x32xf32>
    %c0_16 = arith.constant 0 : index
    %c2 = arith.constant 2 : index
    %c0_17 = arith.constant 0 : index
    %c0_18 = arith.constant 0 : index
    %16 = vector.load %arg4[%c0_16, %c2, %c0_17, %c0_18] : memref<1x4x8x8xf32, #tpu.memory_space<vmem>>, vector<1x1x8x8xf32>
    %17 = vector.shape_cast %16 : vector<1x1x8x8xf32> to vector<8x8xf32>
    %c2_19 = arith.constant 2 : index
    %c0_20 = arith.constant 0 : index
    %c0_21 = arith.constant 0 : index
    %18 = vector.load %arg5[%c2_19, %c0_20, %c0_21] : memref<4x8x32xf32, #tpu.memory_space<vmem>>, vector<1x8x32xf32>
    %19 = vector.shape_cast %18 : vector<1x8x32xf32> to vector<8x32xf32>
    %cst_22 = arith.constant dense<0.000000e+00> : vector<8x32xf32>
    %20 = tpu.matmul %17, %19, %cst_22 {dimension_numbers = #tpu.dot_dimension_numbers<[1], [0], [0], [1], [0, 0, 1, 1], [], []>} : vector<8x8xf32>, vector<8x32xf32>, vector<8x32xf32> -> vector<8x32xf32>
    %21 = arith.addf %15, %20 : vector<8x32xf32>
    %c0_23 = arith.constant 0 : index
    %c3 = arith.constant 3 : index
    %c0_24 = arith.constant 0 : index
    %c0_25 = arith.constant 0 : index
    %22 = vector.load %arg4[%c0_23, %c3, %c0_24, %c0_25] : memref<1x4x8x8xf32, #tpu.memory_space<vmem>>, vector<1x1x8x8xf32>
    %23 = vector.shape_cast %22 : vector<1x1x8x8xf32> to vector<8x8xf32>
    %c3_26 = arith.constant 3 : index
    %c0_27 = arith.constant 0 : index
    %c0_28 = arith.constant 0 : index
    %24 = vector.load %arg5[%c3_26, %c0_27, %c0_28] : memref<4x8x32xf32, #tpu.memory_space<vmem>>, vector<1x8x32xf32>
    %25 = vector.shape_cast %24 : vector<1x8x32xf32> to vector<8x32xf32>
    %cst_29 = arith.constant dense<0.000000e+00> : vector<8x32xf32>
    %26 = tpu.matmul %23, %25, %cst_29 {dimension_numbers = #tpu.dot_dimension_numbers<[1], [0], [0], [1], [0, 0, 1, 1], [], []>} : vector<8x8xf32>, vector<8x32xf32>, vector<8x32xf32> -> vector<8x32xf32>
    %27 = arith.addf %21, %26 : vector<8x32xf32>
    %c0_30 = arith.constant 0 : index
    %c0_31 = arith.constant 0 : index
    %28 = vector.load %arg8[%c0_30, %c0_31] : memref<8x32xf32, #tpu.memory_space<vmem>>, vector<8x32xf32>
    tpu.vector_store %arg8[%c0_30, %c0_31], %27 {strides = array<i32>} : memref<8x32xf32, #tpu.memory_space<vmem>>, vector<8x32xf32>,
    %c0_i32_32 = arith.constant 0 : i32
    %29 = arith.cmpi eq, %arg3, %c0_i32_32 : i32
    %30 = arith.extui %29 : i1 to i32
    %c0_i32_33 = arith.constant 0 : i32
    %31 = arith.cmpi ne, %30, %c0_i32_33 : i32
    scf.if %31 {
      %c0_34 = arith.constant 0 : index
      %c0_35 = arith.constant 0 : index
      %32 = vector.load %arg8[%c0_34, %c0_35] : memref<8x32xf32, #tpu.memory_space<vmem>>, vector<8x32xf32>
      %c0_36 = arith.constant 0 : index
      %c0_37 = arith.constant 0 : index
      %33 = vector.load %arg6[%c0_36, %c0_37] : memref<1x32xf32, #tpu.memory_space<vmem>>, vector<1x32xf32>
      %34 = vector.broadcast %33 : vector<1x32xf32> to vector<8x32xf32>
      %35 = arith.addf %32, %34 : vector<8x32xf32>
      %c0_38 = arith.constant 0 : index
      %c0_39 = arith.constant 0 : index
      %c0_40 = arith.constant 0 : index
      %36 = vector.load %arg7[%c0_38, %c0_39, %c0_40] : memref<1x8x32xf32, #tpu.memory_space<vmem>>, vector<1x8x32xf32>
      %37 = vector.shape_cast %36 : vector<1x8x32xf32> to vector<8x32xf32>
      %38 = vector.shape_cast %35 : vector<8x32xf32> to vector<1x8x32xf32>
      tpu.vector_store %arg7[%c0_38, %c0_39, %c0_40], %38 {strides = array<i32>} : memref<1x8x32xf32, #tpu.memory_space<vmem>>, vector<1x8x32xf32>,
    } else {
    }
    return
  }
  func.func @transform_0(%arg0: i32, %arg1: i32, %arg2: i32, %arg3: i32) -> (i32, i32, i32, i32) {
    %c0_i32 = arith.constant 0 : i32
    %c0_i32_0 = arith.constant 0 : i32
    return %arg0, %arg3, %arg1, %c0_i32 : i32, i32, i32, i32
  }
  func.func @transform_1(%arg0: i32, %arg1: i32, %arg2: i32, %arg3: i32) -> (i32, i32, i32) {
    %c0_i32 = arith.constant 0 : i32
    %c0_i32_0 = arith.constant 0 : i32
    return %arg3, %c0_i32, %arg2 : i32, i32, i32
  }
  func.func @transform_2(%arg0: i32, %arg1: i32, %arg2: i32, %arg3: i32) -> (i32, i32) {
    %c0_i32 = arith.constant 0 : i32
    %c0_i32_0 = arith.constant 0 : i32
    return %c0_i32, %arg2 : i32, i32
  }
  func.func @transform_3(%arg0: i32, %arg1: i32, %arg2: i32, %arg3: i32) -> (i32, i32, i32) {
    %c0_i32 = arith.constant 0 : i32
    return %arg0, %arg1, %arg2 : i32, i32, i32
  }
}

</mosaic_0001>

<bundles_post_ra>
// kernel: causal_self_attention_forward.3
= control target key start
LH: loop header
LB: loop body
LE: loop exit
PB: predicated region body
PF: predicated region fallthrough
CT: control target
= control target key end

     0   :  { %s515_s12 = smov 0   ;;  %s517_s13 = smov 0   ;;  %s572_s0 = inlined_call_operand.vmem [shape: f32[2,8,32], index: 0, kind: input, shape index: {}]   ;;  %s573_s1 = inlined_call_operand.vmem [shape: f32[12,32,8], index: 1, kind: input, shape index: {}]   ;;  %s574_s2 = inlined_call_operand.vmem [shape: f32[12,1,8], index: 2, kind: input, shape index: {}]   ;;  %s575_s3 = inlined_call_operand.vmem [shape: f32[2,12,8,8], index: 3, kind: output, shape index: {}]  }
   0x1   :  { %s519_s14 = smov 0   ;;  %s521_s15 = smov 0  }
   0x2   :  { %s523_s16 = smov 0  }
   0x3 LB: > { %s25_s17 = sadd.s32 1, %s485_s14  ;;  %s32_s18 = sadd.s32 1, %s489_s15  ;;  %s493_s16 = sphi %s523_s16, %s13_s16   ;;  %s489_s15 = sphi %s521_s15, %s579_s15   ;;  %s485_s14 = sphi %s519_s14, %s578_s14   ;;  %s481_s13 = sphi %s517_s13, %s577_s13   ;;  %s477_s12 = sphi %s515_s12, %s576_s12  }
   0x4   : > { %p26_p0 = scmp.ge.s32.totalorder %s25_s17, 12  ;;  %p404_p1 = scmp.ge.s32.totalorder %s493_s16, 1 }
   0x5   : > { %p182_p2 = scmp.lt.s32.totalorder %s493_s16, 25 }
   0x6   : > { %s581_s17 = smov (%p26_p0, %s25_s17), 0  ;;  %s583_s18 = smov (!%p26_p0, %s32_s18), %s489_s15 }
   0x7   : > { %p183_p3 = pnand %p404_p1, %p182_p2  ;;  %p34_p4 = scmp.ge.s32.totalorder %s583_s18, 2 }
   0x8   : > { %p229_p5 = scmp.lt.s32.totalorder (!%p183_p3), %s477_s12, 11  ;;  %p222_p6 = scmp.lt.s32.totalorder (!%p183_p3), %s481_s13, 1 }
   0x9   : > { %s585_s18 = smov (%p34_p4, %s583_s18), 0  ;;  %186 = sbr.rel (%p183_p3) target bundleno = 154 (0x9a), region = 32 }
   0xe   : > { %s587_s12 = smov (!%p229_p5, %s477_s12), 11  ;;  %s589_s13 = smov (!%p222_p6, %s481_s13), 1  ;;  %vm257_vm0 = vcmask 261120   ;;  %vm281_vm1 = vcmask 64512  }
   0xf   : > { %s412_s19 = sshll.u32 %s587_s12, 5  ;;  %s236_s22 = scalar_lea.vmem %s574_s2, %s587_s12 }
  0x10   : > { %s233_s25 = scalar_lea.vmem %s573_s1, %s412_s19  ;;  %s405_s26 = sshll.u32 %s589_s13, 3  ;;  %v454_v5 = vld [vmem:[%s236_s22] ss:$0 sm:$0xff] }
  0x11   : > { %v252_v0 = vld [vmem:[%s233_s25 + $0x18] sm:$0xff]  ;;  %v251_v1 = vld [vmem:[%s233_s25 + $0x10] sm:$0xff]  ;;  %s413_s27 = smul.u32 12, %s589_s13  ;;  %v250_v2 = vld [vmem:[%s233_s25 + $0x8] sm:$0xff]  ;;  %s228_s30 = scalar_lea.vmem %s572_s0, %s405_s26 }
  0x12   : > { %273 = vmatpush.msra.mxu0 %v252_v0  ;;  %v249_v3 = vld [vmem:[%s233_s25] sm:$0xff] }
  0x13   : > { %s245_s4 = sadd.s32 %s413_s27, %s587_s12  ;;  %v248_v4 = vld [vmem:[%s228_s30] sm:$0xff] }
  0x14   : > { %274 = vmatpush.msra.mxu0 %v251_v1  ;;  %s408_s5 = sshll.u32 %s245_s4, 3 }
  0x15   : > { %s247_s8 = scalar_lea.vmem %s575_s3, %s408_s5 }
  0x16   : > { %275 = vmatpush.msra.mxu0 %v250_v2 }
  0x18   : > { %276 = vmatpush.msra.mxu0 %v249_v3 }
  0x19   : > { %409 = vmatmul.msk.f32.vlgmr.msra.gmra.mxu0 %vm257_vm0, %v248_v4 }
  0x96   : > { %v278_v6 = vpop.f32.mrf.mxu0 }
  0x97   : > { %v279_v7 = vadd.f32 %v454_v5, %v278_v6 }
  0x99   : > { %282 = vst.msk [vmem:[%s247_s8] sm:$0xff] %vm281_vm1, %v279_v7 }
  0x9a PF: > { %s13_s16 = sadd.s32 1, %s493_s16   ;;  %s576_s12 = smov %s485_s14 }
  0x9b   : > { %p10_p7 = scmp.ge.s32.totalorder %s13_s16, 26   ;;  %s577_s13 = smov %s489_s15 }
  0x9c   : > { %s578_s14 = smov %s581_s17  ;;  %s579_s15 = smov %s585_s18 }
  0x9d   :  { %12 = sbr.rel (!%p10_p7) target bundleno = 3 (0x3), region = 68 }

// kernel: causal_self_attention_forward.5
= control target key start
LH: loop header
LB: loop body
LE: loop exit
PB: predicated region body
PF: predicated region fallthrough
CT: control target
= control target key end

     0   :  { %8 = vsyncpa [#allocation4], 0  ;;  %s833_s0 = inlined_call_operand.vmem [shape: f32[2,4,8,8], index: 0, kind: input, shape index: {}]   ;;  %s834_s1 = inlined_call_operand.vmem [shape: f32[4,8,32], index: 1, kind: input, shape index: {}]   ;;  %s835_s2 = inlined_call_operand.vmem [shape: f32[1,32], index: 2, kind: input, shape index: {}]   ;;  %s836_s3 = inlined_call_operand.hbm [shape: f32[2,8,32], index: 3, kind: output, shape index: {}]  }
   0x1   :  { %10 = vsyncpa [#allocation4 + $0x1], 0  ;;  %s718_s12 = smov 0   ;;  %s720_s13 = smov 0  }
   0x2   :  { %s722_s14 = smov 0   ;;  %s724_s15 = smov 0  }
   0x3   :  { %s726_s16 = smov 0   ;;  %s728_s17 = smov 0  }
   0x4 LB: > { %s535_s18 = sadd.s32 4294967295, %s695_s17   ;;  %s536_s19 = sadd.s32 4294967294, %s695_s17   ;;  %s695_s17 = sphi %s728_s17, %s16_s17   ;;  %s691_s16 = sphi %s726_s16, %s843_s16   ;;  %s687_s15 = sphi %s724_s15, %s842_s15   ;;  %s683_s14 = sphi %s722_s14, %s841_s14   ;;  %s679_s13 = sphi %s720_s13, %s840_s13   ;;  %s675_s12 = sphi %s718_s12, %s839_s12  }
   0x5   : > { %s42_s20 = sadd.s32 1, %s691_s16  ;;  %s137_s21 = sadd.s32 1, %s683_s14 }
   0x6   : > { %p44_p0 = scmp.ge.s32.totalorder %s42_s20, 2  ;;  %p147_p1 = scmp.ne.s32.totalorder %s683_s14, %s679_s13 }
   0x7   : > { %p148_p2 = scmp.eq.s32.totalorder %s535_s18, 1  ;;  %p153_p3 = scmp.ne.s32.totalorder %s679_s13, %s675_s12 }
   0x8   : > { %s845_s20 = smov (%p44_p0, %s42_s20), 0  ;;  %p154_p5 = scmp.eq.s32.totalorder %s536_s19, 1 }
   0x9   : > { %p758_p4 = por %p148_p2, %p147_p1  ;;  %s130_s23 = ssub.s32 %s691_s16, %s845_s20 }
   0xa   : > { %p541_p6 = scmp.ge.s32.totalorder %s695_s17, 1  ;;  %p135_p7 = scmp.eq.s32.totalorder %s130_s23, 0 }
   0xb   : > { %p765_p8 = por %p154_p5, %p153_p3  ;;  %p206_p9 = scmp.lt.s32.totalorder %s695_s17, 3 }
   0xc   : > { %s771_s25 = scalar_select %p135_p7, %s683_s14, %s137_s21  }
   0xd   : > { %p207_p10 = pnand %p541_p6, %p206_p9 }
   0xe   : > { %p249_p11 = scmp.lt.s32.totalorder (!%p207_p10), %s687_s15, 1  ;;  %s245_s18 = sand.u32 (!%p207_p10), 1, %s679_s13  }
   0xf   : > { %210 = sbr.rel (%p207_p10) target bundleno = 174 (0xae), region = 32  ;;  %s542_s19 = sshll.u32 (!%p207_p10), %s245_s18, 3 }
  0x10   : > { %s556_s21 = sshll.u32 (!%p207_p10), %s687_s15, 3  ;;  %s247_s30 = scalar_lea.vmem (!%p207_p10), [#allocation3], %s542_s19 }
  0x11   : > { %s416_s27 = scalar_lea.hbm (!%p207_p10), %s836_s3, %s556_s21  ;;  %s418_s4 = sshll.u32 (!%p207_p10), %s247_s30, 4  ;;  %s419_s4 = int_to_ptr.vmem [resolvable:$true] %s418_s4 }
  0x12   : > { %s420_s5 = sshll.u32 (!%p207_p10), %s416_s27, 4  ;;  %s637_s10 = scalar_lea.hbm (!%p207_p10), %s836_s3, 16  ;;  %s421_s5 = int_to_ptr.hbm [resolvable:$true] %s420_s5 }
  0x13   : > { %s631_s6 = sshra.s32 (!%p207_p10), %s421_s5, 4  ;;  %s632_s6 = int_to_ptr.hbm [resolvable:$true] %s631_s6 }
  0x14   : > { %v550_v0 = vld [vmem:[%s834_s1 + $0x10] sm:$0xff]  ;;  %v281_v1 = vld [vmem:[%s834_s1] sm:$0xff]  ;;  %v553_v2 = vld [vmem:[%s834_s1 + $0x18] sm:$0xff]  ;;  %vm277_vm0 = vcmask 261120   ;;  %s250_s7 = scalar_select %p249_p11, %s687_s15, 1  ;;  %v697_v4 = vmov 0.0  }
  0x15   : > { %357 = vmatpush.msra.mxu2 %v550_v0  ;;  %301 = vmatpush.msra.mxu0 %v281_v1  ;;  %v547_v3 = vld [vmem:[%s834_s1 + $0x8] sm:$0xff]  ;;  %278 = vst.msk [vmem:[#allocation2] sm:$0xff] %vm277_vm0, %v697_v4  ;;  %vm282_vm1 = vcmask 64512   ;;  %v616_v18 = vld [vmem:[%s835_s2] ss:$0 sm:$0xff]  ;;  %s404_s15 = scalar_lea.sflag [#allocation4], %s245_s18  ;;  %p638_p1 = scmp.lt.s32.totalorder %s632_s6, %s836_s3 }
  0x16   : > { %385 = vmatpush.msra.mxu3 %v553_v2  ;;  %329 = vmatpush.msra.mxu1 %v547_v3  ;;  %s559_s8 = sshll.u32 %s250_s7, 5  ;;  %s633_s7 = scalar_lea.hbm %s632_s6, 8 }
  0x17   : > { %s259_s11 = scalar_lea.vmem %s833_s0, %s559_s8  ;;  %p634_p12 = scmp.ne.s32.totalorder %s632_s6, %s633_s7 }
  0x18   : > { %v549_v5 = vld [vmem:[%s259_s11 + $0x10] sm:$0xff]  ;;  %v280_v6 = vld [vmem:[%s259_s11] sm:$0xff]  ;;  %v552_v7 = vld [vmem:[%s259_s11 + $0x18] sm:$0xff]  ;;  %p639_p2 = scmp.lt.s32.totalorder %s637_s10, %s633_s7 }
  0x19   : > { %551 = vmatmul.msk.f32.vlgmr.msra.gmra.mxu2 %vm282_vm1, %v549_v5  ;;  %545 = vmatmul.msk.f32.vlgmr.msra.gmra.mxu0 %vm282_vm1, %v280_v6  ;;  %v546_v8 = vld [vmem:[%s259_s11 + $0x8] sm:$0xff]  ;;  %p635_p13 = pnand %p634_p12, %p758_p4 }
  0x1a   : > { %554 = vmatmul.msk.f32.vlgmr.msra.gmra.mxu3 %vm282_vm1, %v552_v7  ;;  %548 = vmatmul.msk.f32.vlgmr.msra.gmra.mxu1 %vm282_vm1, %v546_v8  ;;  %p640_p3 = por %p639_p2, %p638_p1 }
  0x1b   : > { %p636_p0 = pneg %p635_p13 }
  0x1c   : > { %v279_v9 = vld [vmem:[#allocation2] sm:$0xff] }
  0x1d   : > { %p641_p5 = pnand %p640_p3, %p636_p0 }
  0x96   : > { %v303_v10 = vpop.f32.mrf.mxu0 }
  0x97   : > { %v306_v11 = vadd.f32 %v303_v10, %v279_v9  ;;  %v331_v12 = vpop.f32.mrf.mxu1 }
  0x99   : > { %v334_v13 = vadd.f32 %v331_v12, %v306_v11 }
  0x9c   : > { %v359_v14 = vpop.f32.mrf.mxu2 }
  0x9d   : > { %v362_v15 = vadd.f32 %v359_v14, %v334_v13  ;;  %v387_v16 = vpop.f32.mrf.mxu3 }
  0x9f   : > { %v390_v17 = vadd.f32 %v387_v16, %v362_v15 }
  0xa1   : > { %392 = vst.msk [vmem:[#allocation2] sm:$0xff] %vm277_vm0, %v390_v17 }
  0xa8   : > { %v396_v19 = vld [vmem:[#allocation2] sm:$0xff] }
  0xa9   : > { %v401_v20 = vadd.f32 %v616_v18, %v396_v19 }
  0xab   : > { %402 = vst.msk [vmem:[%s247_s30] sm:$0xff] %vm277_vm0, %v401_v20 }
  0xac   : > { %644 = shalt.err (!%p641_p5)
}
  0xad   : > { %560 = dma.vmem_to_hbm [thread:$0]  (%p758_p4), %s419_s4, 128, %s421_s5, %s404_s15  }
  0xae PF: > { %p566_p6 = scmp.ge.s32.totalorder %s695_s17, 2  ;;  %s432_s18 = sand.u32 1, %s675_s12  }
  0xaf   : > { %s433_s21 = scalar_lea.sflag [#allocation4], %s432_s18 }
  0xb0   : > { %p563_p7 = pnand %p566_p6, %p765_p8 }
  0xb2   : > { %p564_p9 = pneg %p563_p7 }
  0xb4   : > { %670 = dma.done.wait (%p564_p9), %s433_s21, 128  }
  0xb5   : > { %672 = vsyncadd (%p564_p9), %s433_s21, 4294967168  ;;  %s16_s17 = sadd.s32 1, %s695_s17   ;;  %s839_s12 = smov %s679_s13 }
  0xb6   : > { %p13_p10 = scmp.ge.s32.totalorder %s16_s17, 4   ;;  %s840_s13 = smov %s683_s14 }
  0xb7   : > { %s841_s14 = smov %s771_s25  ;;  %s842_s15 = smov %s691_s16 }
  0xb8   : > { %s843_s16 = smov %s845_s20  ;;  %15 = sbr.rel (!%p13_p10) target bundleno = 4 (0x4), region = 87 }
  0xbd   :  { %439 = vsyncpa [#allocation4], 1 }
  0xbe   :  { %441 = vsyncpa [#allocation4 + $0x1], 1 }

// kernel: causal_self_attention_forward.4
= control target key start
LH: loop header
LB: loop body
LE: loop exit
PB: predicated region body
PF: predicated region fallthrough
CT: control target
= control target key end

     0   :  { %s1486_s22 = smov 0   ;;  %s1488_s23 = smov 0   ;;  %s1717_s0 = inlined_call_operand.<no memory space> [shape: s32[1], index: 0, kind: input, shape index: {}, may-alias: {0,1}]   ;;  %s1718_s1 = inlined_call_operand.<no memory space> [shape: s32[1], index: 1, kind: input, shape index: {}, may-alias: {0,1}]   ;;  %s1719_s2 = inlined_call_operand.vmem [shape: f32[2,12,8,8], index: 2, kind: input, shape index: {}, may-alias: {2,3,4}]   ;;  %s1720_s3 = inlined_call_operand.vmem [shape: f32[2,12,8,8], index: 3, kind: input, shape index: {}, may-alias: {2,3,4}]   ;;  %s1721_s4 = inlined_call_operand.vmem [shape: f32[2,12,8,8], index: 4, kind: input, shape index: {}, may-alias: {2,3,4}]   ;;  %s1722_s5 = inlined_call_operand.vmem [shape: f32[2,4,8,8], index: 5, kind: output, shape index: {}]  }
   0x1   :  { %10 = sst [smem:[#allocation6]] %s1717_s0  ;;  %s1490_s24 = smov 0  }
   0x2   :  { %11 = sst [smem:[#allocation7]] %s1718_s1 }
   0x3 LB: > { %s36_s0 = sadd.s32 1, %s1439_s23  ;;  %p1305_p0 = scmp.ge.s32.totalorder %s1443_s24, 1  ;;  %s1443_s24 = sphi %s1490_s24, %s17_s24   ;;  %s1439_s23 = sphi %s1488_s23, %s1724_s23   ;;  %s1435_s22 = sphi %s1486_s22, %s1723_s22  }
   0x4   : > { %p38_p1 = scmp.ge.s32.totalorder %s36_s0, 2  ;;  %p242_p2 = scmp.lt.s32.totalorder %s1443_s24, 3 }
   0x6   : > { %s1726_s0 = smov (%p38_p1, %s36_s0), 0  ;;  %p243_p3 = pnand %p1305_p0, %p242_p2 }
   0x7   : > { %s310_s1 = sld [smem:[#allocation6]] (!%p243_p3)  ;;  %p312_p4 = scmp.lt.s32.totalorder (!%p243_p3), %s1435_s22, 1 }
   0x8   : > { %246 = sbr.rel (%p243_p3) target bundleno = 1234 (0x4d2), region = 32  ;;  %s1504_s25 = sld [smem:[#allocation7]] (!%p243_p3) }
   0xd   : > { %s1728_s22 = smov (!%p312_p4, %s1435_s22), 1  ;;  %p316_p5 = scmp.lt.s32.totalorder %s310_s1, 0 }
   0xe   : > { %s1343_s26 = smul.u32 12, %s1728_s22  ;;  %s1309_s27 = sshll.u32 %s1728_s22, 2 }
   0xf   : > { %s1506_s28 = sshll.u32 %s310_s1, 3  ;;  %p332_p6 = scmp.lt.s32.totalorder %s1504_s25, 0 }
  0x10   : > { %s1312_s29 = sshll.u32 %s1504_s25, 3  ;;  %s1730_s1 = smov (!%p316_p5, %s310_s1), 0 }
  0x11   : > { %s333_s30 = scalar_select %p332_p6, %s1504_s25, 0 }
  0x12   : > { %s320_s6 = sadd.s32 %s1343_s26, %s1730_s1  ;;  %s369_s7 = sadd.s32 %s1309_s27, %s1730_s1 }
  0x13   : > { %s1306_s8 = sshll.u32 %s320_s6, 3  ;;  %s334_s9 = sadd.s32 4, %s333_s30 }
  0x14   : > { %s1514_s12 = scalar_lea.vmem %s1719_s2, %s1306_s8  ;;  %s336_s13 = sadd.s32 %s1343_s26, %s334_s9 }
  0x15   : > { %s1307_s14 = sshll.u32 %s336_s13, 3  ;;  %s351_s15 = sadd.s32 8, %s333_s30 }
  0x16   : > { %s1519_s18 = scalar_lea.vmem %s1720_s3, %s1307_s14  ;;  %s353_s19 = sadd.s32 %s1343_s26, %s351_s15 }
  0x17   : > { %s1308_s20 = sshll.u32 %s353_s19, 3  ;;  %s1310_s21 = sshll.u32 %s369_s7, 3 }
  0x18   : > { %s1524_s27 = scalar_lea.vmem %s1721_s4, %s1308_s20  ;;  %s1529_s8 = scalar_lea.vmem %s1722_s5, %s1310_s21 }
  0x19   : > { %p1313_p7 = scmp.ne.s32.totalorder %s1504_s25, 0 }
  0x1b   : > { %381 = sbr.rel (%p1313_p7) target bundleno = 45 (0x2d), region = 36 }
  0x20   : > { %vm382_vm0 = vcmask 7168   ;;  %v1445_v0 = vmov -1e+30   ;;  %v1446_v1 = vmov 0.0   ;;  %vm391_vm1 = vcmask 64512  }
  0x21   : > { %383 = vst.msk [vmem:[#allocation2] sm:$0xff] %vm382_vm0, %v1445_v0 }
  0x22   : > { %384 = vst.msk [vmem:[#allocation2 + $0x8] sm:$0xff] %vm382_vm0, %v1445_v0 }
  0x23   : > { %385 = vst.msk [vmem:[#allocation2 + $0x10] sm:$0xff] %vm382_vm0, %v1445_v0 }
  0x24   : > { %386 = vst.msk [vmem:[#allocation2 + $0x18] sm:$0xff] %vm382_vm0, %v1445_v0 }
  0x25   : > { %387 = vst.msk [vmem:[#allocation3] sm:$0xff] %vm382_vm0, %v1446_v1 }
  0x26   : > { %388 = vst.msk [vmem:[#allocation3 + $0x8] sm:$0xff] %vm382_vm0, %v1446_v1 }
  0x27   : > { %389 = vst.msk [vmem:[#allocation3 + $0x10] sm:$0xff] %vm382_vm0, %v1446_v1 }
  0x28   : > { %390 = vst.msk [vmem:[#allocation3 + $0x18] sm:$0xff] %vm382_vm0, %v1446_v1 }
  0x29   : > { %392 = vst.msk [vmem:[#allocation4] sm:$0xff] %vm391_vm1, %v1446_v1 }
  0x2a   : > { %393 = vst.msk [vmem:[#allocation4 + $0x8] sm:$0xff] %vm391_vm1, %v1446_v1 }
  0x2b   : > { %394 = vst.msk [vmem:[#allocation4 + $0x10] sm:$0xff] %vm391_vm1, %v1446_v1 }
  0x2c   : > { %395 = vst.msk [vmem:[#allocation4 + $0x18] sm:$0xff] %vm391_vm1, %v1446_v1 }
  0x2d PF: > { %v396_v2 = vld [vmem:[%s1514_s12] sm:$0xff]  ;;  %v397_v3 = vld [vmem:[%s1514_s12 + $0x8] sm:$0xff]  ;;  %v398_v4 = vld [vmem:[%s1514_s12 + $0x10] sm:$0xff]  ;;  %s1537_s26 = sadd.s32 8, %s1312_s29  ;;  %s413_s30 = sadd.s32 1, %s1506_s28 }
  0x2e   : > { %v399_v5 = vld [vmem:[%s1514_s12 + $0x18] sm:$0xff]  ;;  %v1541_v6 = vmul.f32 0.35355338, %v396_v2  ;;  %v1543_v7 = vmul.f32 0.35355338, %v397_v3  ;;  %v1546_v8 = vld [vmem:[%s1519_s18] sm:$0xff]  ;;  %p1314_p8 = scmp.le.s32.totalorder %s1537_s26, %s413_s30 }
  0x2f   : > { %v1548_v9 = vmul.f32 0.35355338, %v398_v4  ;;  %v1550_v10 = vmul.f32 0.35355338, %v399_v5  ;;  %v1553_v11 = vld [vmem:[%s1519_s18 + $0x8] sm:$0xff]  ;;  %v1556_v12 = vld [vmem:[%s1519_s18 + $0x10] sm:$0xff] }
  0x30   : > { %v1559_v13 = vld [vmem:[%s1519_s18 + $0x18] sm:$0xff]  ;;  %v1562_v14 = vld [vmem:[%s1524_s27] sm:$0xff]  ;;  %v1565_v15 = vld [vmem:[%s1524_s27 + $0x8] sm:$0xff]  ;;  %417 = sbr.rel (%p1314_p8) target bundleno = 566 (0x236), region = 40 }
  0x31   : > { %v1568_v16 = vld [vmem:[%s1524_s27 + $0x10] sm:$0xff]  ;;  %v1571_v17 = vld [vmem:[%s1524_s27 + $0x18] sm:$0xff] }
  0x35   : > { %vm418_vm2 = vcmask 64512   ;;  %v523_v18 = vlaneseq  ;;  %v525_v21 = vstv %s1506_s28  ;;  %v529_v22 = vstv %s1312_s29  ;;  %v536_v38 = vld [vmem:[#allocation2] sm:$0xff]  ;;  %v538_v42 = vld [vmem:[#allocation2 + $0x10] sm:$0xff]  ;;  %v537_v44 = vld [vmem:[#allocation2 + $0x8] sm:$0xff] }
  0x36   : > { %1315 = vmatpush.xpose.msk.msra.mxu0 %vm418_vm2, %v1546_v8  ;;  %1319 = vmatpush.xpose.msk.msra.mxu2 %vm418_vm2, %v1556_v12  ;;  %v1447_v37 = vmov 0   ;;  %vm624_vm4 = vcmask 7168   ;;  %v539_v52 = vld [vmem:[#allocation2 + $0x18] sm:$0xff] }
  0x37   : > { %1317 = vmatpush.xpose.msk.msra.mxu1 %vm418_vm2, %v1553_v11  ;;  %1321 = vmatpush.xpose.msk.msra.mxu3 %vm418_vm2, %v1559_v13  ;;  %v524_v19 = vshrl.u32 %v523_v18, 7  ;;  %v528_v20 = vand.u32 127, %v523_v18 }
  0x38   : > { %1374 = vset.pattern.permute.xlu0 %v1447_v37  ;;  %1373 = vset.pattern.permute.xlu2 %v1447_v37 }
  0x39   : > { %1316 = vmatmul.msk.f32.vlgmr.msra.gmra.mxu0 %vm418_vm2, %v1541_v6  ;;  %1320 = vmatmul.msk.f32.vlgmr.msra.gmra.mxu2 %vm418_vm2, %v1548_v9  ;;  %v526_v23 = vadd.s32 %v525_v21, %v524_v19  ;;  %v530_v24 = vadd.s32 %v529_v22, %v528_v20 }
  0x3a   : > { %721 = vmatpush.msrb.mxu2 %v1568_v16  ;;  %1318 = vmatmul.msk.f32.vlgmr.msra.gmra.mxu1 %vm418_vm2, %v1543_v7 }
  0x3b   : > { %744 = vmatpush.msrb.mxu3 %v1571_v17  ;;  %675 = vmatpush.msrb.mxu0 %v1562_v14  ;;  %vm531_vm3 = vcmp.le.s32.totalorder %v530_v24, %v526_v23 }
  0x3c   : > { %1322 = vmatmul.msk.f32.vlgmr.msra.gmra.mxu3 %vm418_vm2, %v1550_v10  ;;  %698 = vmatpush.msrb.mxu1 %v1565_v15 }
  0x3d   : > { %1375 = vset.pattern.permute.xlu1 %v1447_v37 }
  0xb6   : > { %v442_v25 = vpop.f32.mrf.mxu0 }
  0xb7   : > { %v1599_v26 = vsel %vm531_vm3, %v442_v25, -1e+30  ;;  %v468_v28 = vpop.f32.mrf.mxu1 }
  0xb8   : > { %v540_v27 = vsel %vm418_vm2, %v1599_v26, -inf  ;;  %v1603_v29 = vsel %vm531_vm3, %v468_v28, -1e+30 }
  0xb9   : > { %541 = vmax.xlane.f32.xlu1 %v540_v27  ;;  %v543_v33 = vsel %vm418_vm2, %v1603_v29, -inf }
  0xbc   : > { %v494_v30 = vpop.f32.mrf.mxu2 }
  0xbd   : > { %v534_v31 = vsel %vm531_vm3, %v494_v30, -1e+30 }
  0xbe   : > { %v546_v32 = vsel %vm418_vm2, %v534_v31, -inf }
  0xbf   : > { %v520_v34 = vpop.f32.mrf.mxu3  ;;  %547 = vmax.xlane.f32.xlu0 %v546_v32 }
  0xc0   : > { %v535_v35 = vsel %vm531_vm3, %v520_v34, -1e+30  ;;  %v602_v34 = vld [vmem:[#allocation3 + $0x10] sm:$0xff] }
  0xc1   : > { %544 = vmax.xlane.f32.xlu1 %v543_v33  ;;  %v549_v36 = vsel %vm418_vm2, %v535_v35, -inf }
  0xc7   : > { %550 = vmax.xlane.f32.xlu0 %v549_v36 }
 0x12c   : > { %v542_v39 = vpop.xlane.xlu1 %541 }
 0x12d   : > { %v552_v40 = vmax.f32 %v536_v38, %v542_v39 }
 0x12f   : > { %757 = vst.msk [vmem:[#allocation2] sm:$0xff] %vm624_vm4, %v552_v40  ;;  %570 = vperm.xlu0 %1374, %v552_v40   ;;  %v556_v41 = vsub.f32 %v536_v38, %v552_v40  ;;  %v603_v38 = vld [vmem:[#allocation3 + $0x18] sm:$0xff] }
 0x131   : > { %v560_v46 = vmul.f32 1.442695, %v556_v41 }
 0x132   : > { %v548_v43 = vpop.xlane.xlu0 %547 }
 0x133   : > { %v554_v45 = vmax.f32 %v538_v42, %v548_v43  ;;  %1376 = vpow2.f32 %v560_v46 }
 0x134   : > { %v545_v47 = vpop.xlane.xlu1 %544 }
 0x135   : > { %v558_v48 = vsub.f32 %v538_v42, %v554_v45  ;;  %759 = vst.msk [vmem:[#allocation2 + $0x10] sm:$0xff] %vm624_vm4, %v554_v45  ;;  %v553_v49 = vmax.f32 %v537_v44, %v545_v47  ;;  %580 = vperm.xlu2 %1373, %v554_v45   ;;  %v631_v42 = vld [vmem:[#allocation4 + $0x10] sm:$0xff] }
 0x137   : > { %v564_v50 = vmul.f32 1.442695, %v558_v48  ;;  %758 = vst.msk [vmem:[#allocation2 + $0x8] sm:$0xff] %vm624_vm4, %v553_v49  ;;  %575 = vperm.xlu1 %1375, %v553_v49   ;;  %v557_v51 = vsub.f32 %v537_v44, %v553_v49  ;;  %v600_v44 = vld [vmem:[#allocation3] sm:$0xff]  ;;  %v632_v49 = vld [vmem:[#allocation4 + $0x18] sm:$0xff] }
 0x139   : > { %1378 = vpow2.f32 %v564_v50  ;;  %v562_v55 = vmul.f32 1.442695, %v557_v51  ;;  %v1613_v56 = vpop.eup %1376 }
 0x13a   : > { %v551_v53 = vpop.xlane.xlu0 %550  ;;  %v604_v47 = vmul.f32 %v1613_v56, %v600_v44 }
 0x13b   : > { %v555_v54 = vmax.f32 %v539_v52, %v551_v53  ;;  %1380 = vpow2.f32 %v562_v55  ;;  %v629_v53 = vld [vmem:[#allocation4] sm:$0xff] }
 0x13d   : > { %760 = vst.msk [vmem:[#allocation2 + $0x18] sm:$0xff] %vm624_vm4, %v555_v54  ;;  %585 = vperm.xlu2 %1373, %v555_v54   ;;  %v559_v57 = vsub.f32 %v539_v52, %v555_v54  ;;  %v601_v52 = vld [vmem:[#allocation3 + $0x8] sm:$0xff] }
 0x13f   : > { %v1379_v58 = vpop.eup %1378  ;;  %635 = vperm.xlu1 %1375, %v1613_v56   ;;  %v566_v59 = vmul.f32 1.442695, %v559_v57 }
 0x140   : > { %645 = vperm.xlu0 %1374, %v1379_v58  }
 0x141   : > { %v1616_v60 = vpop.eup %1380  ;;  %1382 = vpow2.f32 %v566_v59 }
 0x142   : > { %v605_v57 = vmul.f32 %v1616_v60, %v601_v52 }
 0x147   : > { %640 = vperm.xlu1 %1375, %v1616_v60   ;;  %v1383_v61 = vpop.eup %1382 }
 0x148   : > { %v607_v39 = vmul.f32 %v1383_v61, %v603_v38 }
 0x14f   : > { %650 = vperm.xlu1 %1375, %v1383_v61  }
 0x18f   : > { %v581_v62 = vpop.permute.xlu2 %580 }
 0x190   : > { %v590_v63 = vsub.f32 %v534_v31, %v581_v62 }
 0x192   : > { %v596_v0 = vmul.f32 1.442695, %v590_v63  ;;  %v630_v63 = vld [vmem:[#allocation4 + $0x8] sm:$0xff] }
 0x194   : > { %1384 = vpow2.f32 %v596_v0 }
 0x197   : > { %v586_v1 = vpop.permute.xlu2 %585 }
 0x198   : > { %v591_v2 = vsub.f32 %v535_v35, %v586_v1  ;;  %v606_v35 = vmul.f32 %v1379_v58, %v602_v34 }
 0x19a   : > { %v1385_v3 = vpop.eup %1384  ;;  %v598_v4 = vmul.f32 1.442695, %v591_v2 }
 0x19b   : > { %1325 = vmatmul.msk.f32.vlgmr.msrb.gmra.mxu2 %vm418_vm2, %v1385_v3  ;;  %v614_v5 = vsel %vm418_vm2, %v1385_v3, 0.0 }
 0x19c   : > { %1386 = vpow2.f32 %v598_v4  ;;  %615 = vadd.xlane.f32.xlu0 %v614_v5 }
 0x1a1   : > { %v571_v18 = vpop.permute.xlu0 %570 }
 0x1a2   : > { %v1387_v19 = vpop.eup %1386  ;;  %v588_v20 = vsub.f32 %v1599_v26, %v571_v18 }
 0x1a3   : > { %1326 = vmatmul.msk.f32.vlgmr.msrb.gmra.mxu3 %vm418_vm2, %v1387_v19  ;;  %v617_v21 = vsel %vm418_vm2, %v1387_v19, 0.0 }
 0x1a4   : > { %v592_v22 = vmul.f32 1.442695, %v588_v20  ;;  %618 = vadd.xlane.f32.xlu1 %v617_v21 }
 0x1a6   : > { %1388 = vpow2.f32 %v592_v22 }
 0x1a9   : > { %v576_v23 = vpop.permute.xlu1 %575 }
 0x1aa   : > { %v589_v24 = vsub.f32 %v1603_v29, %v576_v23 }
 0x1ac   : > { %v1389_v25 = vpop.eup %1388  ;;  %v594_v27 = vmul.f32 1.442695, %v589_v24 }
 0x1ad   : > { %1323 = vmatmul.msk.f32.vlgmr.msrb.gmra.mxu0 %vm418_vm2, %v1389_v25  ;;  %v608_v28 = vsel %vm418_vm2, %v1389_v25, 0.0 }
 0x1ae   : > { %1390 = vpow2.f32 %v594_v27  ;;  %609 = vadd.xlane.f32.xlu2 %v608_v28 }
 0x1b1   : > { %v636_v31 = vpop.permute.xlu1 %635 }
 0x1b2   : > { %v646_v33 = vpop.permute.xlu0 %645  ;;  %v653_v58 = vmul.f32 %v636_v31, %v629_v53 }
 0x1b3   : > { %v655_v43 = vmul.f32 %v646_v33, %v631_v42 }
 0x1b4   : > { %v1391_v30 = vpop.eup %1390 }
 0x1b5   : > { %1324 = vmatmul.msk.f32.vlgmr.msrb.gmra.mxu1 %vm418_vm2, %v1391_v30  ;;  %v611_v26 = vsel %vm418_vm2, %v1391_v30, 0.0 }
 0x1b6   : > { %612 = vadd.xlane.f32.xlu2 %v611_v26 }
 0x1b9   : > { %v641_v32 = vpop.permute.xlu1 %640 }
 0x1ba   : > { %v654_v0 = vmul.f32 %v641_v32, %v630_v63 }
 0x1c1   : > { %v651_v29 = vpop.permute.xlu1 %650 }
 0x1c2   : > { %v656_v51 = vmul.f32 %v651_v29, %v632_v49 }
 0x20f   : > { %v616_v36 = vpop.xlane.xlu0 %615 }
 0x210   : > { %v622_v37 = vadd.f32 %v616_v36, %v606_v35 }
 0x212   : > { %627 = vst.msk [vmem:[#allocation3 + $0x10] sm:$0xff] %vm624_vm4, %v622_v37 }
 0x217   : > { %v619_v40 = vpop.xlane.xlu1 %618 }
 0x218   : > { %v623_v41 = vadd.f32 %v619_v40, %v607_v39 }
 0x21a   : > { %628 = vst.msk [vmem:[#allocation3 + $0x18] sm:$0xff] %vm624_vm4, %v623_v41 }
 0x21e   : > { %v723_v45 = vpop.f32.mrf.mxu2 }
 0x21f   : > { %v751_v46 = vadd.f32 %v723_v45, %v655_v43 }
 0x221   : > { %755 = vst.msk [vmem:[#allocation4 + $0x10] sm:$0xff] %vm418_vm2, %v751_v46  ;;  %v610_v48 = vpop.xlane.xlu2 %609 }
 0x222   : > { %v620_v50 = vadd.f32 %v610_v48, %v604_v47 }
 0x224   : > { %625 = vst.msk [vmem:[#allocation3] sm:$0xff] %vm624_vm4, %v620_v50 }
 0x226   : > { %v746_v54 = vpop.f32.mrf.mxu3 }
 0x227   : > { %v752_v55 = vadd.f32 %v746_v54, %v656_v51 }
 0x229   : > { %756 = vst.msk [vmem:[#allocation4 + $0x18] sm:$0xff] %vm418_vm2, %v752_v55  ;;  %v613_v59 = vpop.xlane.xlu2 %612 }
 0x22a   : > { %v621_v61 = vadd.f32 %v613_v59, %v605_v57  ;;  %v677_v56 = vpop.f32.mrf.mxu0 }
 0x22b   : > { %v749_v62 = vadd.f32 %v677_v56, %v653_v58 }
 0x22c   : > { %626 = vst.msk [vmem:[#allocation3 + $0x8] sm:$0xff] %vm624_vm4, %v621_v61 }
 0x22d   : > { %753 = vst.msk [vmem:[#allocation4] sm:$0xff] %vm418_vm2, %v749_v62 }
 0x232   : > { %v700_v1 = vpop.f32.mrf.mxu1 }
 0x233   : > { %v750_v2 = vadd.f32 %v700_v1, %v654_v0 }
 0x235   : > { %754 = vst.msk [vmem:[#allocation4 + $0x8] sm:$0xff] %vm418_vm2, %v750_v2 }
 0x236 PF: > { %p1327_p9 = scmp.gt.s32.totalorder %s1537_s26, %s413_s30 }
 0x238   : > { %764 = sbr.rel (%p1327_p9) target bundleno = 1085 (0x43d), region = 44 }
 0x23d   : > { %vm765_vm5 = vcmask 64512   ;;  %vm958_vm6 = vcmask 7168   ;;  %v872_v3 = vld [vmem:[#allocation2 + $0x10] sm:$0xff]  ;;  %v871_v5 = vld [vmem:[#allocation2 + $0x8] sm:$0xff]  ;;  %v873_v25 = vld [vmem:[#allocation2 + $0x18] sm:$0xff] }
 0x23e   : > { %1328 = vmatpush.xpose.msk.msra.mxu0 %vm765_vm5, %v1546_v8  ;;  %1332 = vmatpush.xpose.msk.msra.mxu2 %vm765_vm5, %v1556_v12  ;;  %v936_v59 = vld [vmem:[#allocation3 + $0x10] sm:$0xff]  ;;  %v937_v0 = vld [vmem:[#allocation3 + $0x18] sm:$0xff] }
 0x23f   : > { %1330 = vmatpush.xpose.msk.msra.mxu1 %vm765_vm5, %v1553_v11  ;;  %1334 = vmatpush.xpose.msk.msra.mxu3 %vm765_vm5, %v1559_v13 }
 0x241   : > { %1329 = vmatmul.msk.f32.vlgmr.msra.gmra.mxu0 %vm765_vm5, %v1541_v6  ;;  %1333 = vmatmul.msk.f32.vlgmr.msra.gmra.mxu2 %vm765_vm5, %v1548_v9 }
 0x242   : > { %1055 = vmatpush.msrb.mxu2 %v1568_v16  ;;  %1331 = vmatmul.msk.f32.vlgmr.msra.gmra.mxu1 %vm765_vm5, %v1543_v7 }
 0x243   : > { %1078 = vmatpush.msrb.mxu3 %v1571_v17  ;;  %1009 = vmatpush.msrb.mxu0 %v1562_v14  ;;  %v1448_v14 = vmov 0  }
 0x244   : > { %1335 = vmatmul.msk.f32.vlgmr.msra.gmra.mxu3 %vm765_vm5, %v1550_v10  ;;  %1032 = vmatpush.msrb.mxu1 %v1565_v15  ;;  %v870_v15 = vld [vmem:[#allocation2] sm:$0xff] }
 0x245   : > { %1393 = vset.pattern.permute.xlu0 %v1448_v14  ;;  %1392 = vset.pattern.permute.xlu2 %v1448_v14 }
 0x246   : > { %1394 = vset.pattern.permute.xlu1 %v1448_v14  ;;  %v966_v14 = vld [vmem:[#allocation4 + $0x18] sm:$0xff] }
 0x2be   : > { %v1662_v8 = vpop.f32.mrf.mxu0 }
 0x2bf   : > { %v874_v11 = vsel %vm765_vm5, %v1662_v8, -inf  ;;  %v1666_v6 = vpop.f32.mrf.mxu1 }
 0x2c0   : > { %875 = vmax.xlane.f32.xlu1 %v874_v11  ;;  %v877_v7 = vsel %vm765_vm5, %v1666_v6, -inf  ;;  %v965_v11 = vld [vmem:[#allocation4 + $0x10] sm:$0xff] }
 0x2c4   : > { %v841_v12 = vpop.f32.mrf.mxu2 }
 0x2c5   : > { %v880_v9 = vsel %vm765_vm5, %v841_v12, -inf }
 0x2c6   : > { %881 = vmax.xlane.f32.xlu0 %v880_v9 }
 0x2c7   : > { %v867_v10 = vpop.f32.mrf.mxu3 }
 0x2c8   : > { %878 = vmax.xlane.f32.xlu1 %v877_v7  ;;  %v883_v13 = vsel %vm765_vm5, %v867_v10, -inf }
 0x2ce   : > { %884 = vmax.xlane.f32.xlu0 %v883_v13 }
 0x333   : > { %v876_v16 = vpop.xlane.xlu1 %875 }
 0x334   : > { %v886_v17 = vmax.f32 %v870_v15, %v876_v16 }
 0x336   : > { %1091 = vst.msk [vmem:[#allocation2] sm:$0xff] %vm958_vm6, %v886_v17  ;;  %904 = vperm.xlu0 %1393, %v886_v17   ;;  %v890_v60 = vsub.f32 %v870_v15, %v886_v17  ;;  %v935_v17 = vld [vmem:[#allocation3 + $0x8] sm:$0xff] }
 0x338   : > { %v894_v19 = vmul.f32 1.442695, %v890_v60  ;;  %v963_v60 = vld [vmem:[#allocation4] sm:$0xff] }
 0x339   : > { %v882_v4 = vpop.xlane.xlu0 %881 }
 0x33a   : > { %v888_v18 = vmax.f32 %v872_v3, %v882_v4  ;;  %1395 = vpow2.f32 %v894_v19 }
 0x33b   : > { %v879_v20 = vpop.xlane.xlu1 %878 }
 0x33c   : > { %v892_v21 = vsub.f32 %v872_v3, %v888_v18  ;;  %1093 = vst.msk [vmem:[#allocation2 + $0x10] sm:$0xff] %vm958_vm6, %v888_v18  ;;  %v887_v22 = vmax.f32 %v871_v5, %v879_v20  ;;  %914 = vperm.xlu2 %1392, %v888_v18  }
 0x33e   : > { %v898_v23 = vmul.f32 1.442695, %v892_v21  ;;  %1092 = vst.msk [vmem:[#allocation2 + $0x8] sm:$0xff] %vm958_vm6, %v887_v22  ;;  %909 = vperm.xlu1 %1394, %v887_v22   ;;  %v891_v24 = vsub.f32 %v871_v5, %v887_v22 }
 0x340   : > { %1397 = vpow2.f32 %v898_v23  ;;  %v896_v30 = vmul.f32 1.442695, %v891_v24  ;;  %v1676_v26 = vpop.eup %1395  ;;  %v964_v23 = vld [vmem:[#allocation4 + $0x8] sm:$0xff] }
 0x341   : > { %v885_v27 = vpop.xlane.xlu0 %884 }
 0x342   : > { %v889_v28 = vmax.f32 %v873_v25, %v885_v27  ;;  %1399 = vpow2.f32 %v896_v30 }
 0x344   : > { %1094 = vst.msk [vmem:[#allocation2 + $0x18] sm:$0xff] %vm958_vm6, %v889_v28  ;;  %919 = vperm.xlu2 %1392, %v889_v28   ;;  %v893_v31 = vsub.f32 %v873_v25, %v889_v28 }
 0x346   : > { %v1398_v32 = vpop.eup %1397  ;;  %969 = vperm.xlu1 %1394, %v1676_v26   ;;  %v900_v33 = vmul.f32 1.442695, %v893_v31 }
 0x347   : > { %979 = vperm.xlu0 %1393, %v1398_v32   ;;  %v940_v61 = vmul.f32 %v1398_v32, %v936_v59 }
 0x348   : > { %v1679_v34 = vpop.eup %1399  ;;  %1401 = vpow2.f32 %v900_v33 }
 0x349   : > { %v939_v5 = vmul.f32 %v1679_v34, %v935_v17 }
 0x34e   : > { %974 = vperm.xlu1 %1394, %v1679_v34   ;;  %v1402_v35 = vpop.eup %1401 }
 0x34f   : > { %v941_v1 = vmul.f32 %v1402_v35, %v937_v0 }
 0x356   : > { %984 = vperm.xlu1 %1394, %v1402_v35  }
 0x396   : > { %v915_v29 = vpop.permute.xlu2 %914 }
 0x397   : > { %v924_v36 = vsub.f32 %v841_v12, %v915_v29  ;;  %v934_v12 = vld [vmem:[#allocation3] sm:$0xff] }
 0x399   : > { %v930_v37 = vmul.f32 1.442695, %v924_v36 }
 0x39b   : > { %1403 = vpow2.f32 %v930_v37 }
 0x39e   : > { %v920_v38 = vpop.permute.xlu2 %919 }
 0x39f   : > { %v925_v39 = vsub.f32 %v867_v10, %v920_v38  ;;  %v938_v10 = vmul.f32 %v1676_v26, %v934_v12 }
 0x3a1   : > { %v1404_v40 = vpop.eup %1403  ;;  %v932_v41 = vmul.f32 1.442695, %v925_v39 }
 0x3a2   : > { %1338 = vmatmul.msk.f32.vlgmr.msrb.gmra.mxu2 %vm765_vm5, %v1404_v40  ;;  %v948_v42 = vsel %vm765_vm5, %v1404_v40, 0.0 }
 0x3a3   : > { %1405 = vpow2.f32 %v932_v41  ;;  %949 = vadd.xlane.f32.xlu0 %v948_v42 }
 0x3a8   : > { %v905_v43 = vpop.permute.xlu0 %904 }
 0x3a9   : > { %v1406_v44 = vpop.eup %1405  ;;  %v922_v45 = vsub.f32 %v1662_v8, %v905_v43 }
 0x3aa   : > { %1339 = vmatmul.msk.f32.vlgmr.msrb.gmra.mxu3 %vm765_vm5, %v1406_v44  ;;  %v951_v46 = vsel %vm765_vm5, %v1406_v44, 0.0 }
 0x3ab   : > { %v926_v47 = vmul.f32 1.442695, %v922_v45  ;;  %952 = vadd.xlane.f32.xlu1 %v951_v46 }
 0x3ad   : > { %1407 = vpow2.f32 %v926_v47 }
 0x3b0   : > { %v910_v48 = vpop.permute.xlu1 %909 }
 0x3b1   : > { %v923_v49 = vsub.f32 %v1666_v6, %v910_v48 }
 0x3b3   : > { %v1408_v50 = vpop.eup %1407  ;;  %v928_v51 = vmul.f32 1.442695, %v923_v49 }
 0x3b4   : > { %1336 = vmatmul.msk.f32.vlgmr.msrb.gmra.mxu0 %vm765_vm5, %v1408_v50  ;;  %v942_v52 = vsel %vm765_vm5, %v1408_v50, 0.0 }
 0x3b5   : > { %1409 = vpow2.f32 %v928_v51  ;;  %943 = vadd.xlane.f32.xlu2 %v942_v52 }
 0x3b8   : > { %v970_v55 = vpop.permute.xlu1 %969 }
 0x3b9   : > { %v980_v58 = vpop.permute.xlu0 %979  ;;  %v987_v18 = vmul.f32 %v970_v55, %v963_v60 }
 0x3ba   : > { %v989_v6 = vmul.f32 %v980_v58, %v965_v11 }
 0x3bb   : > { %v1410_v53 = vpop.eup %1409 }
 0x3bc   : > { %1337 = vmatmul.msk.f32.vlgmr.msrb.gmra.mxu1 %vm765_vm5, %v1410_v53  ;;  %v945_v54 = vsel %vm765_vm5, %v1410_v53, 0.0 }
 0x3bd   : > { %946 = vadd.xlane.f32.xlu2 %v945_v54 }
 0x3c0   : > { %v975_v57 = vpop.permute.xlu1 %974 }
 0x3c1   : > { %v988_v24 = vmul.f32 %v975_v57, %v964_v23 }
 0x3c8   : > { %v985_v56 = vpop.permute.xlu1 %984 }
 0x3c9   : > { %v990_v16 = vmul.f32 %v985_v56, %v966_v14 }
 0x416   : > { %v950_v62 = vpop.xlane.xlu0 %949 }
 0x417   : > { %v956_v63 = vadd.f32 %v950_v62, %v940_v61 }
 0x419   : > { %961 = vst.msk [vmem:[#allocation3 + $0x10] sm:$0xff] %vm958_vm6, %v956_v63 }
 0x41e   : > { %v953_v2 = vpop.xlane.xlu1 %952 }
 0x41f   : > { %v957_v8 = vadd.f32 %v953_v2, %v941_v1 }
 0x421   : > { %962 = vst.msk [vmem:[#allocation3 + $0x18] sm:$0xff] %vm958_vm6, %v957_v8 }
 0x425   : > { %v1057_v9 = vpop.f32.mrf.mxu2 }
 0x426   : > { %v1085_v7 = vadd.f32 %v1057_v9, %v989_v6 }
 0x428   : > { %1089 = vst.msk [vmem:[#allocation4 + $0x10] sm:$0xff] %vm765_vm5, %v1085_v7  ;;  %v944_v13 = vpop.xlane.xlu2 %943 }
 0x429   : > { %v954_v15 = vadd.f32 %v944_v13, %v938_v10 }
 0x42b   : > { %959 = vst.msk [vmem:[#allocation3] sm:$0xff] %vm958_vm6, %v954_v15 }
 0x42d   : > { %v1080_v3 = vpop.f32.mrf.mxu3 }
 0x42e   : > { %v1086_v4 = vadd.f32 %v1080_v3, %v990_v16 }
 0x430   : > { %1090 = vst.msk [vmem:[#allocation4 + $0x18] sm:$0xff] %vm765_vm5, %v1086_v4  ;;  %v947_v19 = vpop.xlane.xlu2 %946 }
 0x431   : > { %v955_v20 = vadd.f32 %v947_v19, %v939_v5  ;;  %v1011_v21 = vpop.f32.mrf.mxu0 }
 0x432   : > { %v1083_v22 = vadd.f32 %v1011_v21, %v987_v18 }
 0x433   : > { %960 = vst.msk [vmem:[#allocation3 + $0x8] sm:$0xff] %vm958_vm6, %v955_v20 }
 0x434   : > { %1087 = vst.msk [vmem:[#allocation4] sm:$0xff] %vm765_vm5, %v1083_v22 }
 0x439   : > { %v1034_v25 = vpop.f32.mrf.mxu1 }
 0x43a   : > { %v1084_v27 = vadd.f32 %v1034_v25, %v988_v24 }
 0x43c   : > { %1088 = vst.msk [vmem:[#allocation4 + $0x8] sm:$0xff] %vm765_vm5, %v1084_v27 }
 0x43d PF: > { %s1095_s25 = sadd.s32 8, %s1506_s28 }
 0x43e   : > { %p1340_p10 = scmp.lt.s32.totalorder %s1537_s26, %s1095_s25 }
 0x440   : > { %1099 = sbr.rel (%p1340_p10) target bundleno = 1234 (0x4d2), region = 48 }
 0x445   : > { %v1102_v28 = vld [vmem:[#allocation3 + $0x10] sm:$0xff]  ;;  %v1100_v30 = vld [vmem:[#allocation3] sm:$0xff]  ;;  %v1103_v26 = vld [vmem:[#allocation3 + $0x18] sm:$0xff]  ;;  %v1449_v31 = vmov 0   ;;  %vm1148_vm7 = vcmask 64512  }
 0x446   : > { %1412 = vset.pattern.permute.xlu1 %v1449_v31  ;;  %1411 = vset.pattern.permute.xlu0 %v1449_v31  ;;  %1413 = vrcp.f32 %v1102_v28  ;;  %v1101_v32 = vld [vmem:[#allocation3 + $0x8] sm:$0xff]  ;;  %v1122_v48 = vld [vmem:[#allocation4 + $0x10] sm:$0xff]  ;;  %v1120_v49 = vld [vmem:[#allocation4] sm:$0xff] }
 0x447   : > { %1415 = vrcp.f32 %v1100_v30  ;;  %v1123_v54 = vld [vmem:[#allocation4 + $0x18] sm:$0xff]  ;;  %v1121_v55 = vld [vmem:[#allocation4 + $0x8] sm:$0xff] }
 0x448   : > { %1417 = vrcp.f32 %v1103_v26 }
 0x449   : > { %1419 = vrcp.f32 %v1101_v32 }
 0x44c   : > { %v1414_v33 = vpop.eup %1413 }
 0x44d   : > { %v1416_v34 = vpop.eup %1415  ;;  %v1110_v35 = vmul.f32 %v1414_v33, %v1102_v28 }
 0x44e   : > { %v1418_v29 = vpop.eup %1417  ;;  %v1108_v36 = vmul.f32 %v1416_v34, %v1100_v30 }
 0x44f   : > { %v1420_v37 = vpop.eup %1419  ;;  %v1114_v38 = vsub.f32 2.0, %v1110_v35  ;;  %v1111_v39 = vmul.f32 %v1418_v29, %v1103_v26 }
 0x450   : > { %v1112_v40 = vsub.f32 2.0, %v1108_v36  ;;  %v1109_v41 = vmul.f32 %v1420_v37, %v1101_v32 }
 0x451   : > { %v1118_v42 = vmul.f32 %v1414_v33, %v1114_v38  ;;  %v1115_v44 = vsub.f32 2.0, %v1111_v39 }
 0x452   : > { %v1116_v43 = vmul.f32 %v1416_v34, %v1112_v40  ;;  %v1113_v45 = vsub.f32 2.0, %v1109_v41 }
 0x453   : > { %1136 = vperm.xlu1 %1412, %v1118_v42   ;;  %v1119_v46 = vmul.f32 %v1418_v29, %v1115_v44 }
 0x454   : > { %1126 = vperm.xlu0 %1411, %v1116_v43   ;;  %v1117_v47 = vmul.f32 %v1420_v37, %v1113_v45 }
 0x45b   : > { %1141 = vperm.xlu1 %1412, %v1119_v46  }
 0x45c   : > { %1131 = vperm.xlu0 %1411, %v1117_v47  }
 0x4c5   : > { %v1137_v50 = vpop.permute.xlu1 %1136 }
 0x4c6   : > { %v1146_v51 = vmul.f32 %v1137_v50, %v1122_v48  ;;  %v1127_v52 = vpop.permute.xlu0 %1126 }
 0x4c7   : > { %v1144_v53 = vmul.f32 %v1127_v52, %v1120_v49 }
 0x4c8   : > { %1151 = vst.msk [vmem:[%s1529_s8 + $0x10] sm:$0xff] %vm1148_vm7, %v1146_v51 }
 0x4c9   : > { %1149 = vst.msk [vmem:[%s1529_s8] sm:$0xff] %vm1148_vm7, %v1144_v53 }
 0x4cd   : > { %v1142_v57 = vpop.permute.xlu1 %1141 }
 0x4ce   : > { %v1147_v58 = vmul.f32 %v1142_v57, %v1123_v54  ;;  %v1132_v59 = vpop.permute.xlu0 %1131 }
 0x4cf   : > { %v1145_v61 = vmul.f32 %v1132_v59, %v1121_v55 }
 0x4d0   : > { %1152 = vst.msk [vmem:[%s1529_s8 + $0x18] sm:$0xff] %vm1148_vm7, %v1147_v58 }
 0x4d1   : > { %1150 = vst.msk [vmem:[%s1529_s8 + $0x8] sm:$0xff] %vm1148_vm7, %v1145_v61 }
 0x4d2 PF: > { %s17_s24 = sadd.s32 1, %s1443_s24   ;;  %s1723_s22 = smov %s1439_s23 }
 0x4d3   : > { %p14_p11 = scmp.ge.s32.totalorder %s17_s24, 4   ;;  %s1724_s23 = smov %s1726_s0 }
 0x4d5   :  { %16 = sbr.rel (!%p14_p11) target bundleno = 3 (0x3), region = 84 }

</bundles_post_ra>
